<compile_context>
chip_gen: v6e
topology: v6e:2x2x1
jax: 0.10.0
libtpu: 0.0.40
codegen_flags: <defaults>
</compile_context>

<pallas_src>
import functools
import math

import jax
import jax.numpy as jnp
from jax.experimental import pallas as pl
from jax.experimental.pallas import tpu as pltpu

NLANE = 128  # lane width: padded per-head dim and padded num_labels dim


# ---------------------------------------------------------------------------
# Single fused Pallas kernel: embeddings-LN -> encoder -> pooler -> classifier
# ---------------------------------------------------------------------------
def _clinicalbert_kernel(
    # inputs
    emb_ref, bias_ref, tfidf_ref,
    embg_ref, embb_ref,
    wq_ref, bq_ref, wk_ref, bk_ref, wv_ref, bv_ref,
    woh_ref, bo_ref, ln1g_ref, ln1b_ref,
    wi_ref, bi_ref, wf_ref, bf_ref, ln2g_ref, ln2b_ref,
    poolw_ref, poolb_ref,
    w1p_ref, w1t_ref, b1_ref, w2_ref, b2_ref,
    # outputs
    logits_ref,
    *, num_layers, num_heads, batch, seq, eps):
  f32 = jnp.float32
  bf16 = jnp.bfloat16

  def mm(a, b):
    # bf16 MXU operands (no-op cast if already bf16), f32 accumulation
    return jnp.dot(a.astype(bf16), b.astype(bf16), preferred_element_type=f32)

  def layer_norm(x, g, b):
    mu = jnp.mean(x, axis=-1, keepdims=True)
    xc = x - mu
    var = jnp.mean(xc * xc, axis=-1, keepdims=True)
    return xc * jax.lax.rsqrt(var + eps) * g + b

  def gelu(x):
    # TODO(synk): HF BERT default hidden_act='gelu' is the exact erf form;
    # tanh approximation used here (small numerical drift).
    return 0.5 * x * (1.0 + jnp.tanh(0.7978845608028654 *
                                     (x + 0.044715 * x * x * x)))

  # additive attention bias (block-diagonal over batches, padding mask folded
  # in); hoisted: loaded once, reused by every (layer, head)
  bias = bias_ref[...]                                              # (B*S, B*S)

  # --- embedding LayerNorm ---
  h = layer_norm(emb_ref[...], embg_ref[...], embb_ref[...])        # (B*S, H)

  # --- transformer encoder: batch folded into the row (sublane) dimension ---
  for l in range(num_layers):
    hb = h.astype(bf16)          # cast once per layer for the Q/K/V matmuls
    acc = None
    for hd in range(num_heads):
      i = l * num_heads + hd
      # per-head projections; head dim zero-padded to 128 lanes (lane-dense),
      # softmax scale pre-folded into wq / bq at pack time
      q = mm(hb, wq_ref[i]) + bq_ref[i]                             # (B*S, 128)
      k = mm(hb, wk_ref[i]) + bk_ref[i]
      v = mm(hb, wv_ref[i]) + bv_ref[i]
      # contract last dims: MXU consumes K transposed, no XLU transpose
      s = jax.lax.dot_general(q.astype(bf16), k.astype(bf16),
                              (((1,), (1,)), ((), ())),
                              preferred_element_type=f32) + bias    # (B*S, B*S)
      m = jnp.max(s, axis=-1, keepdims=True)
      p = jnp.exp(s - m)
      p = p * pl.reciprocal(jnp.sum(p, axis=-1, keepdims=True), approx=True)
      # ctx @ Wo == sum_h (ctx_h @ Wo[h*dh:(h+1)*dh, :]) ; padded rows are zero
      contrib = mm(mm(p, v), woh_ref[i])                            # (B*S, H)
      acc = contrib if acc is None else acc + contrib
    h = layer_norm(h + acc + bo_ref[l], ln1g_ref[l], ln1b_ref[l])
    ffn = gelu(mm(h, wi_ref[l]) + bi_ref[l])
    ffn = mm(ffn, wf_ref[l]) + bf_ref[l]
    h = layer_norm(h + ffn, ln2g_ref[l], ln2b_ref[l])

  # --- BERT pooler on the [CLS] rows (direct 8-aligned row slices) ---
  cls = jnp.concatenate(
      [h[b * seq:b * seq + 1, :] for b in range(batch)], axis=0)    # (B, H)
  pooled = jnp.tanh(mm(cls, poolw_ref[...]) + poolb_ref[...])

  # --- classifier: cat(pooled, tfidf) -> Linear(256) -> ReLU -> Dropout -> Linear
  # concat expressed as split matmul: [pooled|tfidf] @ W1 == pooled@W1p + tfidf@W1t
  hid = jnp.maximum(mm(pooled, w1p_ref[...]) +
                    mm(tfidf_ref[...], w1t_ref[...]) + b1_ref[...], 0.0)
  # TODO(synk): Dropout(0.2) is training-mode stochastic; eval mode is identity.
  # num_labels padded to 128 -> lane-dense (unmasked) output store
  logits_ref[...] = (mm(hid, w2_ref[...]) + b2_ref[...]).astype(logits_ref.dtype)


# ---------------------------------------------------------------------------
# Synthetic BERT + classifier parameters (deterministic init)
# ---------------------------------------------------------------------------
CFG = dict(
    vocab_size=100,
    hidden=32,
    num_heads=2,
    head_dim=16,
    num_layers=2,
    intermediate=64,
    max_pos=16,
    type_vocab=2,
    num_labels=10,
    tfidf=16,
)


def init_params(key):
    c = CFG
    H, I = c["hidden"], c["intermediate"]
    keys = iter(jax.random.split(key, 64))
    nrm = lambda shape: (0.02 * jax.random.normal(next(keys), shape, jnp.float32))
    p = {
        "word_emb": nrm((c["vocab_size"], H)),
        "pos_emb": nrm((c["max_pos"], H)),
        "type_emb": nrm((c["type_vocab"], H)),
        "emb_ln_g": jnp.ones((H,), jnp.float32),
        "emb_ln_b": jnp.zeros((H,), jnp.float32),
        "layers": [],
        "pool_w": nrm((H, H)),
        "pool_b": jnp.zeros((H,), jnp.float32),
        "cls1_w": nrm((H + c["tfidf"], 256)),
        "cls1_b": jnp.zeros((256,), jnp.float32),
        "cls2_w": nrm((256, c["num_labels"])),
        "cls2_b": jnp.zeros((c["num_labels"],), jnp.float32),
    }
    for _ in range(c["num_layers"]):
        p["layers"].append({
            "wq": nrm((H, H)), "bq": jnp.zeros((H,), jnp.float32),
            "wk": nrm((H, H)), "bk": jnp.zeros((H,), jnp.float32),
            "wv": nrm((H, H)), "bv": jnp.zeros((H,), jnp.float32),
            "wo": nrm((H, H)), "bo": jnp.zeros((H,), jnp.float32),
            "ln1_g": jnp.ones((H,), jnp.float32), "ln1_b": jnp.zeros((H,), jnp.float32),
            "wi": nrm((H, I)), "bi": jnp.zeros((I,), jnp.float32),
            "wf": nrm((I, H)), "bf": jnp.zeros((H,), jnp.float32),
            "ln2_g": jnp.ones((H,), jnp.float32), "ln2_b": jnp.zeros((H,), jnp.float32),
        })
    return p


def _pack_params(params):
    """Stack per-layer/per-head weights (leading-dim indexed in-kernel), pad the
    per-head dim and num_labels to 128 lanes, fold softmax scale into wq/bq,
    and store matmul weights as bf16."""
    c = CFG
    H, nh, dh = c["hidden"], c["num_heads"], c["head_dim"]
    layers = params["layers"]
    scale = 1.0 / math.sqrt(dh)
    bf16 = jnp.bfloat16

    pad_cols = lambda w: jnp.pad(w, ((0, 0), (0, NLANE - dh)))   # (H,dh)->(H,128)
    pad_rows = lambda w: jnp.pad(w, ((0, NLANE - dh), (0, 0)))   # (dh,H)->(128,H)
    pad_bias = lambda v: jnp.pad(v, (0, NLANE - dh))[None, :]    # (dh,)->(1,128)

    pk = {
        "emb_ln_g": params["emb_ln_g"][None, :],
        "emb_ln_b": params["emb_ln_b"][None, :],
        # per-(layer, head) projections: index = l*nh + hd
        "wq": jnp.stack([pad_cols(lp["wq"][:, hd*dh:(hd+1)*dh] * scale)
                         for lp in layers for hd in range(nh)]).astype(bf16),
        "bq": jnp.stack([pad_bias(lp["bq"][hd*dh:(hd+1)*dh] * scale)
                         for lp in layers for hd in range(nh)]),
        "wk": jnp.stack([pad_cols(lp["wk"][:, hd*dh:(hd+1)*dh])
                         for lp in layers for hd in range(nh)]).astype(bf16),
        "bk": jnp.stack([pad_bias(lp["bk"][hd*dh:(hd+1)*dh])
                         for lp in layers for hd in range(nh)]),
        "wv": jnp.stack([pad_cols(lp["wv"][:, hd*dh:(hd+1)*dh])
                         for lp in layers for hd in range(nh)]).astype(bf16),
        "bv": jnp.stack([pad_bias(lp["bv"][hd*dh:(hd+1)*dh])
                         for lp in layers for hd in range(nh)]),
        "woh": jnp.stack([pad_rows(lp["wo"][hd*dh:(hd+1)*dh, :])
                          for lp in layers for hd in range(nh)]).astype(bf16),
        "bo": jnp.stack([lp["bo"][None, :] for lp in layers]),
        "ln1g": jnp.stack([lp["ln1_g"][None, :] for lp in layers]),
        "ln1b": jnp.stack([lp["ln1_b"][None, :] for lp in layers]),
        "wi": jnp.stack([lp["wi"] for lp in layers]).astype(bf16),
        "bi": jnp.stack([lp["bi"][None, :] for lp in layers]),
        "wf": jnp.stack([lp["wf"] for lp in layers]).astype(bf16),
        "bf": jnp.stack([lp["bf"][None, :] for lp in layers]),
        "ln2g": jnp.stack([lp["ln2_g"][None, :] for lp in layers]),
        "ln2b": jnp.stack([lp["ln2_b"][None, :] for lp in layers]),
        "pool_w": params["pool_w"].astype(bf16),
        "pool_b": params["pool_b"][None, :],
        # split classifier weight: [pooled | tfidf] @ W1 == pooled@W1p + tfidf@W1t
        "w1p": params["cls1_w"][:H, :].astype(bf16),
        "w1t": params["cls1_w"][H:, :].astype(bf16),
        "b1": params["cls1_b"][None, :],
        # num_labels padded to 128 lanes -> lane-dense logits slab
        "w2": jnp.pad(params["cls2_w"],
                      ((0, 0), (0, NLANE - c["num_labels"]))).astype(bf16),
        "b2": jnp.pad(params["cls2_b"], (0, NLANE - c["num_labels"]))[None, :],
    }
    return pk


# ---------------------------------------------------------------------------
# Forward pass: embedding gather + mask prep in XLA (glue), rest in one kernel
# ---------------------------------------------------------------------------
def forward(params, input_ids, attention_mask, tfidf_features):
    c = CFG
    B, S = input_ids.shape
    assert S <= c["max_pos"], "sequence length exceeds max position embeddings"
    H = c["hidden"]

    # embeddings (gather is glue); token_type_ids default to 0 as in HF BERT
    emb = (jnp.take(params["word_emb"], input_ids, axis=0)
           + params["pos_emb"][:S][None, :, :]
           + params["type_emb"][0][None, None, :])
    emb2d = emb.reshape(B * S, H).astype(jnp.float32)

    # additive attention bias: block-diagonal over batches with the padding
    # mask folded in.  Lets the kernel fold the batch loop into the sublane
    # dimension (one scores/softmax/context matmul per head per layer).
    mask_flat = attention_mask.reshape(B * S).astype(jnp.float32)
    batch_id = jnp.repeat(jnp.arange(B), S)
    same_batch = batch_id[:, None] == batch_id[None, :]
    valid = jnp.where(same_batch, mask_flat[None, :], 0.0)
    attn_bias = (1.0 - valid) * (-1e9)                                # (B*S, B*S)

    pk = _pack_params(params)
    kern = functools.partial(
        _clinicalbert_kernel,
        num_layers=c["num_layers"], num_heads=c["num_heads"],
        batch=B, seq=S, eps=1e-12)

    # Single grid-less invocation: every operand is a whole-array VMEM block.
    logits_pad = pl.pallas_call(
        kern,
        out_shape=jax.ShapeDtypeStruct((B, NLANE), jnp.float32),
        compiler_params=pltpu.CompilerParams(vmem_limit_bytes=32 * 1024 * 1024),
    )(
        emb2d, attn_bias, tfidf_features.astype(jnp.float32),
        pk["emb_ln_g"], pk["emb_ln_b"],
        pk["wq"], pk["bq"], pk["wk"], pk["bk"], pk["wv"], pk["bv"],
        pk["woh"], pk["bo"], pk["ln1g"], pk["ln1b"],
        pk["wi"], pk["bi"], pk["wf"], pk["bf"], pk["ln2g"], pk["ln2b"],
        pk["pool_w"], pk["pool_b"],
        pk["w1p"], pk["w1t"], pk["b1"], pk["w2"], pk["b2"],
    )
    return logits_pad[:, :c["num_labels"]]


# ---------------------------------------------------------------------------
if __name__ == "__main__":
    key = jax.random.PRNGKey(0)
    k_param, k_ids, k_tfidf = jax.random.split(key, 3)

    B, S = 2, 8
    params = init_params(k_param)
    input_ids = jax.random.randint(k_ids, (B, S), 0, CFG["vocab_size"], dtype=jnp.int32)
    attention_mask = jnp.ones((B, S), dtype=jnp.int32)
    tfidf_features = jax.random.normal(k_tfidf, (B, CFG["tfidf"]), jnp.float32)

    logits = jax.jit(forward)(params, input_ids, attention_mask, tfidf_features)
    jax.block_until_ready(logits)
    assert logits.shape == (B, CFG["num_labels"]), logits.shape
    print("KERNEL_OK")
</pallas_src>

<mosaic_0001>
module attributes {stable_mosaic.version = 11 : i64} {
  func.func @_clinicalbert_kernel(%arg0: memref<16x32xf32, #tpu.memory_space<vmem>>, %arg1: memref<16x16xf32, #tpu.memory_space<vmem>>, %arg2: memref<2x16xf32, #tpu.memory_space<vmem>>, %arg3: memref<1x32xf32, #tpu.memory_space<vmem>>, %arg4: memref<1x32xf32, #tpu.memory_space<vmem>>, %arg5: memref<4x32x128xbf16, #tpu.memory_space<vmem>>, %arg6: memref<4x1x128xf32, #tpu.memory_space<vmem>>, %arg7: memref<4x32x128xbf16, #tpu.memory_space<vmem>>, %arg8: memref<4x1x128xf32, #tpu.memory_space<vmem>>, %arg9: memref<4x32x128xbf16, #tpu.memory_space<vmem>>, %arg10: memref<4x1x128xf32, #tpu.memory_space<vmem>>, %arg11: memref<4x128x32xbf16, #tpu.memory_space<vmem>>, %arg12: memref<2x1x32xf32, #tpu.memory_space<vmem>>, %arg13: memref<2x1x32xf32, #tpu.memory_space<vmem>>, %arg14: memref<2x1x32xf32, #tpu.memory_space<vmem>>, %arg15: memref<2x32x64xbf16, #tpu.memory_space<vmem>>, %arg16: memref<2x1x64xf32, #tpu.memory_space<vmem>>, %arg17: memref<2x64x32xbf16, #tpu.memory_space<vmem>>, %arg18: memref<2x1x32xf32, #tpu.memory_space<vmem>>, %arg19: memref<2x1x32xf32, #tpu.memory_space<vmem>>, %arg20: memref<2x1x32xf32, #tpu.memory_space<vmem>>, %arg21: memref<32x32xbf16, #tpu.memory_space<vmem>>, %arg22: memref<1x32xf32, #tpu.memory_space<vmem>>, %arg23: memref<32x256xbf16, #tpu.memory_space<vmem>>, %arg24: memref<16x256xbf16, #tpu.memory_space<vmem>>, %arg25: memref<1x256xf32, #tpu.memory_space<vmem>>, %arg26: memref<256x128xbf16, #tpu.memory_space<vmem>>, %arg27: memref<1x128xf32, #tpu.memory_space<vmem>>, %arg28: memref<2x128xf32, #tpu.memory_space<vmem>>) attributes {dimension_semantics = [], scalar_prefetch = 0 : i64, scratch_operands = 0 : i64, tpu.core_type = #tpu.core_type<tc>} {
    %c0 = arith.constant 0 : index
    %c0_0 = arith.constant 0 : index
    %0 = vector.load %arg1[%c0, %c0_0] : memref<16x16xf32, #tpu.memory_space<vmem>>, vector<16x16xf32>
    %c0_1 = arith.constant 0 : index
    %c0_2 = arith.constant 0 : index
    %1 = vector.load %arg0[%c0_1, %c0_2] : memref<16x32xf32, #tpu.memory_space<vmem>>, vector<16x32xf32>
    %c0_3 = arith.constant 0 : index
    %c0_4 = arith.constant 0 : index
    %2 = vector.load %arg3[%c0_3, %c0_4] : memref<1x32xf32, #tpu.memory_space<vmem>>, vector<1x32xf32>
    %c0_5 = arith.constant 0 : index
    %c0_6 = arith.constant 0 : index
    %3 = vector.load %arg4[%c0_5, %c0_6] : memref<1x32xf32, #tpu.memory_space<vmem>>, vector<1x32xf32>
    %cst = arith.constant dense<0.000000e+00> : vector<16xf32>
    %4 = vector.multi_reduction <add>, %1, %cst [1] : vector<16x32xf32> to vector<16xf32>
    %5 = vector.shape_cast %4 : vector<16xf32> to vector<16x1xf32>
    %cst_7 = arith.constant 3.200000e+01 : f32
    %6 = vector.broadcast %cst_7 : f32 to vector<16x1xf32>
    %7 = arith.divf %5, %6 : vector<16x1xf32>
    %8 = vector.broadcast %7 : vector<16x1xf32> to vector<16x32xf32>
    %9 = arith.subf %1, %8 : vector<16x32xf32>
    %10 = arith.mulf %9, %9 : vector<16x32xf32>
    %cst_8 = arith.constant dense<0.000000e+00> : vector<16xf32>
    %11 = vector.multi_reduction <add>, %10, %cst_8 [1] : vector<16x32xf32> to vector<16xf32>
    %12 = vector.shape_cast %11 : vector<16xf32> to vector<16x1xf32>
    %cst_9 = arith.constant 3.200000e+01 : f32
    %13 = vector.broadcast %cst_9 : f32 to vector<16x1xf32>
    %14 = arith.divf %12, %13 : vector<16x1xf32>
    %cst_10 = arith.constant 9.99999996E-13 : f32
    %15 = vector.broadcast %cst_10 : f32 to vector<16x1xf32>
    %16 = arith.addf %14, %15 : vector<16x1xf32>
    %17 = math.rsqrt %16 : vector<16x1xf32>
    %18 = vector.broadcast %17 : vector<16x1xf32> to vector<16x32xf32>
    %19 = arith.mulf %9, %18 : vector<16x32xf32>
    %20 = vector.broadcast %2 : vector<1x32xf32> to vector<16x32xf32>
    %21 = arith.mulf %19, %20 : vector<16x32xf32>
    %22 = vector.broadcast %3 : vector<1x32xf32> to vector<16x32xf32>
    %23 = arith.addf %21, %22 : vector<16x32xf32>
    %24 = arith.truncf %23 : vector<16x32xf32> to vector<16x32xbf16>
    %c0_11 = arith.constant 0 : index
    %c0_12 = arith.constant 0 : index
    %c0_13 = arith.constant 0 : index
    %25 = vector.load %arg5[%c0_11, %c0_12, %c0_13] : memref<4x32x128xbf16, #tpu.memory_space<vmem>>, vector<1x32x128xbf16>
    %26 = vector.shape_cast %25 : vector<1x32x128xbf16> to vector<32x128xbf16>
    %cst_14 = arith.constant dense<0.000000e+00> : vector<16x128xf32>
    %27 = tpu.matmul %24, %26, %cst_14 {dimension_numbers = #tpu.dot_dimension_numbers<[1], [0], [0], [1], [0, 0, 1, 1], [], []>} : vector<16x32xbf16>, vector<32x128xbf16>, vector<16x128xf32> -> vector<16x128xf32>
    %c0_15 = arith.constant 0 : index
    %c0_16 = arith.constant 0 : index
    %c0_17 = arith.constant 0 : index
    %28 = vector.load %arg6[%c0_15, %c0_16, %c0_17] : memref<4x1x128xf32, #tpu.memory_space<vmem>>, vector<1x1x128xf32>
    %29 = vector.shape_cast %28 : vector<1x1x128xf32> to vector<1x128xf32>
    %30 = vector.broadcast %29 : vector<1x128xf32> to vector<16x128xf32>
    %31 = arith.addf %27, %30 : vector<16x128xf32>
    %c0_18 = arith.constant 0 : index
    %c0_19 = arith.constant 0 : index
    %c0_20 = arith.constant 0 : index
    %32 = vector.load %arg7[%c0_18, %c0_19, %c0_20] : memref<4x32x128xbf16, #tpu.memory_space<vmem>>, vector<1x32x128xbf16>
    %33 = vector.shape_cast %32 : vector<1x32x128xbf16> to vector<32x128xbf16>
    %cst_21 = arith.constant dense<0.000000e+00> : vector<16x128xf32>
    %34 = tpu.matmul %24, %33, %cst_21 {dimension_numbers = #tpu.dot_dimension_numbers<[1], [0], [0], [1], [0, 0, 1, 1], [], []>} : vector<16x32xbf16>, vector<32x128xbf16>, vector<16x128xf32> -> vector<16x128xf32>
    %c0_22 = arith.constant 0 : index
    %c0_23 = arith.constant 0 : index
    %c0_24 = arith.constant 0 : index
    %35 = vector.load %arg8[%c0_22, %c0_23, %c0_24] : memref<4x1x128xf32, #tpu.memory_space<vmem>>, vector<1x1x128xf32>
    %36 = vector.shape_cast %35 : vector<1x1x128xf32> to vector<1x128xf32>
    %37 = vector.broadcast %36 : vector<1x128xf32> to vector<16x128xf32>
    %38 = arith.addf %34, %37 : vector<16x128xf32>
    %c0_25 = arith.constant 0 : index
    %c0_26 = arith.constant 0 : index
    %c0_27 = arith.constant 0 : index
    %39 = vector.load %arg9[%c0_25, %c0_26, %c0_27] : memref<4x32x128xbf16, #tpu.memory_space<vmem>>, vector<1x32x128xbf16>
    %40 = vector.shape_cast %39 : vector<1x32x128xbf16> to vector<32x128xbf16>
    %cst_28 = arith.constant dense<0.000000e+00> : vector<16x128xf32>
    %41 = tpu.matmul %24, %40, %cst_28 {dimension_numbers = #tpu.dot_dimension_numbers<[1], [0], [0], [1], [0, 0, 1, 1], [], []>} : vector<16x32xbf16>, vector<32x128xbf16>, vector<16x128xf32> -> vector<16x128xf32>
    %c0_29 = arith.constant 0 : index
    %c0_30 = arith.constant 0 : index
    %c0_31 = arith.constant 0 : index
    %42 = vector.load %arg10[%c0_29, %c0_30, %c0_31] : memref<4x1x128xf32, #tpu.memory_space<vmem>>, vector<1x1x128xf32>
    %43 = vector.shape_cast %42 : vector<1x1x128xf32> to vector<1x128xf32>
    %44 = vector.broadcast %43 : vector<1x128xf32> to vector<16x128xf32>
    %45 = arith.addf %41, %44 : vector<16x128xf32>
    %46 = arith.truncf %31 : vector<16x128xf32> to vector<16x128xbf16>
    %47 = arith.truncf %38 : vector<16x128xf32> to vector<16x128xbf16>
    %cst_32 = arith.constant dense<0.000000e+00> : vector<16x16xf32>
    %48 = tpu.matmul %46, %47, %cst_32 {dimension_numbers = #tpu.dot_dimension_numbers<[1], [1], [0], [0], [0, 0, 1, 0], [], []>} : vector<16x128xbf16>, vector<16x128xbf16>, vector<16x16xf32> -> vector<16x16xf32>
    %49 = arith.addf %48, %0 : vector<16x16xf32>
    %cst_33 = arith.constant dense<0xFF800000> : vector<16xf32>
    %50 = vector.multi_reduction <maximumf>, %49, %cst_33 [1] : vector<16x16xf32> to vector<16xf32>
    %51 = vector.shape_cast %50 : vector<16xf32> to vector<16x1xf32>
    %52 = vector.broadcast %51 : vector<16x1xf32> to vector<16x16xf32>
    %53 = arith.subf %49, %52 : vector<16x16xf32>
    %54 = math.exp %53 : vector<16x16xf32>
    %cst_34 = arith.constant dense<0.000000e+00> : vector<16xf32>
    %55 = vector.multi_reduction <add>, %54, %cst_34 [1] : vector<16x16xf32> to vector<16xf32>
    %56 = vector.shape_cast %55 : vector<16xf32> to vector<16x1xf32>
    %57 = tpu.reciprocal %56 {approx = true} : vector<16x1xf32> -> vector<16x1xf32>
    %58 = vector.broadcast %57 : vector<16x1xf32> to vector<16x16xf32>
    %59 = arith.mulf %54, %58 : vector<16x16xf32>
    %60 = arith.truncf %59 : vector<16x16xf32> to vector<16x16xbf16>
    %61 = arith.truncf %45 : vector<16x128xf32> to vector<16x128xbf16>
    %cst_35 = arith.constant dense<0.000000e+00> : vector<16x128xf32>
    %62 = tpu.matmul %60, %61, %cst_35 {dimension_numbers = #tpu.dot_dimension_numbers<[1], [0], [0], [1], [0, 0, 1, 1], [], []>} : vector<16x16xbf16>, vector<16x128xbf16>, vector<16x128xf32> -> vector<16x128xf32>
    %c0_36 = arith.constant 0 : index
    %c0_37 = arith.constant 0 : index
    %c0_38 = arith.constant 0 : index
    %63 = vector.load %arg11[%c0_36, %c0_37, %c0_38] : memref<4x128x32xbf16, #tpu.memory_space<vmem>>, vector<1x128x32xbf16>
    %64 = vector.shape_cast %63 : vector<1x128x32xbf16> to vector<128x32xbf16>
    %65 = arith.truncf %62 : vector<16x128xf32> to vector<16x128xbf16>
    %cst_39 = arith.constant dense<0.000000e+00> : vector<16x32xf32>
    %66 = tpu.matmul %65, %64, %cst_39 {dimension_numbers = #tpu.dot_dimension_numbers<[1], [0], [0], [1], [0, 0, 1, 1], [], []>} : vector<16x128xbf16>, vector<128x32xbf16>, vector<16x32xf32> -> vector<16x32xf32>
    %c1 = arith.constant 1 : index
    %c0_40 = arith.constant 0 : index
    %c0_41 = arith.constant 0 : index
    %67 = vector.load %arg5[%c1, %c0_40, %c0_41] : memref<4x32x128xbf16, #tpu.memory_space<vmem>>, vector<1x32x128xbf16>
    %68 = vector.shape_cast %67 : vector<1x32x128xbf16> to vector<32x128xbf16>
    %cst_42 = arith.constant dense<0.000000e+00> : vector<16x128xf32>
    %69 = tpu.matmul %24, %68, %cst_42 {dimension_numbers = #tpu.dot_dimension_numbers<[1], [0], [0], [1], [0, 0, 1, 1], [], []>} : vector<16x32xbf16>, vector<32x128xbf16>, vector<16x128xf32> -> vector<16x128xf32>
    %c1_43 = arith.constant 1 : index
    %c0_44 = arith.constant 0 : index
    %c0_45 = arith.constant 0 : index
    %70 = vector.load %arg6[%c1_43, %c0_44, %c0_45] : memref<4x1x128xf32, #tpu.memory_space<vmem>>, vector<1x1x128xf32>
    %71 = vector.shape_cast %70 : vector<1x1x128xf32> to vector<1x128xf32>
    %72 = vector.broadcast %71 : vector<1x128xf32> to vector<16x128xf32>
    %73 = arith.addf %69, %72 : vector<16x128xf32>
    %c1_46 = arith.constant 1 : index
    %c0_47 = arith.constant 0 : index
    %c0_48 = arith.constant 0 : index
    %74 = vector.load %arg7[%c1_46, %c0_47, %c0_48] : memref<4x32x128xbf16, #tpu.memory_space<vmem>>, vector<1x32x128xbf16>
    %75 = vector.shape_cast %74 : vector<1x32x128xbf16> to vector<32x128xbf16>
    %cst_49 = arith.constant dense<0.000000e+00> : vector<16x128xf32>
    %76 = tpu.matmul %24, %75, %cst_49 {dimension_numbers = #tpu.dot_dimension_numbers<[1], [0], [0], [1], [0, 0, 1, 1], [], []>} : vector<16x32xbf16>, vector<32x128xbf16>, vector<16x128xf32> -> vector<16x128xf32>
    %c1_50 = arith.constant 1 : index
    %c0_51 = arith.constant 0 : index
    %c0_52 = arith.constant 0 : index
    %77 = vector.load %arg8[%c1_50, %c0_51, %c0_52] : memref<4x1x128xf32, #tpu.memory_space<vmem>>, vector<1x1x128xf32>
    %78 = vector.shape_cast %77 : vector<1x1x128xf32> to vector<1x128xf32>
    %79 = vector.broadcast %78 : vector<1x128xf32> to vector<16x128xf32>
    %80 = arith.addf %76, %79 : vector<16x128xf32>
    %c1_53 = arith.constant 1 : index
    %c0_54 = arith.constant 0 : index
    %c0_55 = arith.constant 0 : index
    %81 = vector.load %arg9[%c1_53, %c0_54, %c0_55] : memref<4x32x128xbf16, #tpu.memory_space<vmem>>, vector<1x32x128xbf16>
    %82 = vector.shape_cast %81 : vector<1x32x128xbf16> to vector<32x128xbf16>
    %cst_56 = arith.constant dense<0.000000e+00> : vector<16x128xf32>
    %83 = tpu.matmul %24, %82, %cst_56 {dimension_numbers = #tpu.dot_dimension_numbers<[1], [0], [0], [1], [0, 0, 1, 1], [], []>} : vector<16x32xbf16>, vector<32x128xbf16>, vector<16x128xf32> -> vector<16x128xf32>
    %c1_57 = arith.constant 1 : index
    %c0_58 = arith.constant 0 : index
    %c0_59 = arith.constant 0 : index
    %84 = vector.load %arg10[%c1_57, %c0_58, %c0_59] : memref<4x1x128xf32, #tpu.memory_space<vmem>>, vector<1x1x128xf32>
    %85 = vector.shape_cast %84 : vector<1x1x128xf32> to vector<1x128xf32>
    %86 = vector.broadcast %85 : vector<1x128xf32> to vector<16x128xf32>
    %87 = arith.addf %83, %86 : vector<16x128xf32>
    %88 = arith.truncf %73 : vector<16x128xf32> to vector<16x128xbf16>
    %89 = arith.truncf %80 : vector<16x128xf32> to vector<16x128xbf16>
    %cst_60 = arith.constant dense<0.000000e+00> : vector<16x16xf32>
    %90 = tpu.matmul %88, %89, %cst_60 {dimension_numbers = #tpu.dot_dimension_numbers<[1], [1], [0], [0], [0, 0, 1, 0], [], []>} : vector<16x128xbf16>, vector<16x128xbf16>, vector<16x16xf32> -> vector<16x16xf32>
    %91 = arith.addf %90, %0 : vector<16x16xf32>
    %cst_61 = arith.constant dense<0xFF800000> : vector<16xf32>
    %92 = vector.multi_reduction <maximumf>, %91, %cst_61 [1] : vector<16x16xf32> to vector<16xf32>
    %93 = vector.shape_cast %92 : vector<16xf32> to vector<16x1xf32>
    %94 = vector.broadcast %93 : vector<16x1xf32> to vector<16x16xf32>
    %95 = arith.subf %91, %94 : vector<16x16xf32>
    %96 = math.exp %95 : vector<16x16xf32>
    %cst_62 = arith.constant dense<0.000000e+00> : vector<16xf32>
    %97 = vector.multi_reduction <add>, %96, %cst_62 [1] : vector<16x16xf32> to vector<16xf32>
    %98 = vector.shape_cast %97 : vector<16xf32> to vector<16x1xf32>
    %99 = tpu.reciprocal %98 {approx = true} : vector<16x1xf32> -> vector<16x1xf32>
    %100 = vector.broadcast %99 : vector<16x1xf32> to vector<16x16xf32>
    %101 = arith.mulf %96, %100 : vector<16x16xf32>
    %102 = arith.truncf %101 : vector<16x16xf32> to vector<16x16xbf16>
    %103 = arith.truncf %87 : vector<16x128xf32> to vector<16x128xbf16>
    %cst_63 = arith.constant dense<0.000000e+00> : vector<16x128xf32>
    %104 = tpu.matmul %102, %103, %cst_63 {dimension_numbers = #tpu.dot_dimension_numbers<[1], [0], [0], [1], [0, 0, 1, 1], [], []>} : vector<16x16xbf16>, vector<16x128xbf16>, vector<16x128xf32> -> vector<16x128xf32>
    %c1_64 = arith.constant 1 : index
    %c0_65 = arith.constant 0 : index
    %c0_66 = arith.constant 0 : index
    %105 = vector.load %arg11[%c1_64, %c0_65, %c0_66] : memref<4x128x32xbf16, #tpu.memory_space<vmem>>, vector<1x128x32xbf16>
    %106 = vector.shape_cast %105 : vector<1x128x32xbf16> to vector<128x32xbf16>
    %107 = arith.truncf %104 : vector<16x128xf32> to vector<16x128xbf16>
    %cst_67 = arith.constant dense<0.000000e+00> : vector<16x32xf32>
    %108 = tpu.matmul %107, %106, %cst_67 {dimension_numbers = #tpu.dot_dimension_numbers<[1], [0], [0], [1], [0, 0, 1, 1], [], []>} : vector<16x128xbf16>, vector<128x32xbf16>, vector<16x32xf32> -> vector<16x32xf32>
    %109 = arith.addf %66, %108 : vector<16x32xf32>
    %110 = arith.addf %23, %109 : vector<16x32xf32>
    %c0_68 = arith.constant 0 : index
    %c0_69 = arith.constant 0 : index
    %c0_70 = arith.constant 0 : index
    %111 = vector.load %arg12[%c0_68, %c0_69, %c0_70] : memref<2x1x32xf32, #tpu.memory_space<vmem>>, vector<1x1x32xf32>
    %112 = vector.shape_cast %111 : vector<1x1x32xf32> to vector<1x32xf32>
    %113 = vector.broadcast %112 : vector<1x32xf32> to vector<16x32xf32>
    %114 = arith.addf %110, %113 : vector<16x32xf32>
    %c0_71 = arith.constant 0 : index
    %c0_72 = arith.constant 0 : index
    %c0_73 = arith.constant 0 : index
    %115 = vector.load %arg13[%c0_71, %c0_72, %c0_73] : memref<2x1x32xf32, #tpu.memory_space<vmem>>, vector<1x1x32xf32>
    %116 = vector.shape_cast %115 : vector<1x1x32xf32> to vector<1x32xf32>
    %c0_74 = arith.constant 0 : index
    %c0_75 = arith.constant 0 : index
    %c0_76 = arith.constant 0 : index
    %117 = vector.load %arg14[%c0_74, %c0_75, %c0_76] : memref<2x1x32xf32, #tpu.memory_space<vmem>>, vector<1x1x32xf32>
    %118 = vector.shape_cast %117 : vector<1x1x32xf32> to vector<1x32xf32>
    %cst_77 = arith.constant dense<0.000000e+00> : vector<16xf32>
    %119 = vector.multi_reduction <add>, %114, %cst_77 [1] : vector<16x32xf32> to vector<16xf32>
    %120 = vector.shape_cast %119 : vector<16xf32> to vector<16x1xf32>
    %cst_78 = arith.constant 3.200000e+01 : f32
    %121 = vector.broadcast %cst_78 : f32 to vector<16x1xf32>
    %122 = arith.divf %120, %121 : vector<16x1xf32>
    %123 = vector.broadcast %122 : vector<16x1xf32> to vector<16x32xf32>
    %124 = arith.subf %114, %123 : vector<16x32xf32>
    %125 = arith.mulf %124, %124 : vector<16x32xf32>
    %cst_79 = arith.constant dense<0.000000e+00> : vector<16xf32>
    %126 = vector.multi_reduction <add>, %125, %cst_79 [1] : vector<16x32xf32> to vector<16xf32>
    %127 = vector.shape_cast %126 : vector<16xf32> to vector<16x1xf32>
    %cst_80 = arith.constant 3.200000e+01 : f32
    %128 = vector.broadcast %cst_80 : f32 to vector<16x1xf32>
    %129 = arith.divf %127, %128 : vector<16x1xf32>
    %cst_81 = arith.constant 9.99999996E-13 : f32
    %130 = vector.broadcast %cst_81 : f32 to vector<16x1xf32>
    %131 = arith.addf %129, %130 : vector<16x1xf32>
    %132 = math.rsqrt %131 : vector<16x1xf32>
    %133 = vector.broadcast %132 : vector<16x1xf32> to vector<16x32xf32>
    %134 = arith.mulf %124, %133 : vector<16x32xf32>
    %135 = vector.broadcast %116 : vector<1x32xf32> to vector<16x32xf32>
    %136 = arith.mulf %134, %135 : vector<16x32xf32>
    %137 = vector.broadcast %118 : vector<1x32xf32> to vector<16x32xf32>
    %138 = arith.addf %136, %137 : vector<16x32xf32>
    %c0_82 = arith.constant 0 : index
    %c0_83 = arith.constant 0 : index
    %c0_84 = arith.constant 0 : index
    %139 = vector.load %arg15[%c0_82, %c0_83, %c0_84] : memref<2x32x64xbf16, #tpu.memory_space<vmem>>, vector<1x32x64xbf16>
    %140 = vector.shape_cast %139 : vector<1x32x64xbf16> to vector<32x64xbf16>
    %141 = arith.truncf %138 : vector<16x32xf32> to vector<16x32xbf16>
    %cst_85 = arith.constant dense<0.000000e+00> : vector<16x64xf32>
    %142 = tpu.matmul %141, %140, %cst_85 {dimension_numbers = #tpu.dot_dimension_numbers<[1], [0], [0], [1], [0, 0, 1, 1], [], []>} : vector<16x32xbf16>, vector<32x64xbf16>, vector<16x64xf32> -> vector<16x64xf32>
    %c0_86 = arith.constant 0 : index
    %c0_87 = arith.constant 0 : index
    %c0_88 = arith.constant 0 : index
    %143 = vector.load %arg16[%c0_86, %c0_87, %c0_88] : memref<2x1x64xf32, #tpu.memory_space<vmem>>, vector<1x1x64xf32>
    %144 = vector.shape_cast %143 : vector<1x1x64xf32> to vector<1x64xf32>
    %145 = vector.broadcast %144 : vector<1x64xf32> to vector<16x64xf32>
    %146 = arith.addf %142, %145 : vector<16x64xf32>
    %cst_89 = arith.constant 5.000000e-01 : f32
    %147 = vector.broadcast %cst_89 : f32 to vector<16x64xf32>
    %148 = arith.mulf %147, %146 : vector<16x64xf32>
    %cst_90 = arith.constant 4.471500e-02 : f32
    %149 = vector.broadcast %cst_90 : f32 to vector<16x64xf32>
    %150 = arith.mulf %149, %146 : vector<16x64xf32>
    %151 = arith.mulf %150, %146 : vector<16x64xf32>
    %152 = arith.mulf %151, %146 : vector<16x64xf32>
    %153 = arith.addf %146, %152 : vector<16x64xf32>
    %cst_91 = arith.constant 0.797884583 : f32
    %154 = vector.broadcast %cst_91 : f32 to vector<16x64xf32>
    %155 = arith.mulf %154, %153 : vector<16x64xf32>
    %156 = math.tanh %155 : vector<16x64xf32>
    %cst_92 = arith.constant 1.000000e+00 : f32
    %157 = vector.broadcast %cst_92 : f32 to vector<16x64xf32>
    %158 = arith.addf %157, %156 : vector<16x64xf32>
    %159 = arith.mulf %148, %158 : vector<16x64xf32>
    %c0_93 = arith.constant 0 : index
    %c0_94 = arith.constant 0 : index
    %c0_95 = arith.constant 0 : index
    %160 = vector.load %arg17[%c0_93, %c0_94, %c0_95] : memref<2x64x32xbf16, #tpu.memory_space<vmem>>, vector<1x64x32xbf16>
    %161 = vector.shape_cast %160 : vector<1x64x32xbf16> to vector<64x32xbf16>
    %162 = arith.truncf %159 : vector<16x64xf32> to vector<16x64xbf16>
    %cst_96 = arith.constant dense<0.000000e+00> : vector<16x32xf32>
    %163 = tpu.matmul %162, %161, %cst_96 {dimension_numbers = #tpu.dot_dimension_numbers<[1], [0], [0], [1], [0, 0, 1, 1], [], []>} : vector<16x64xbf16>, vector<64x32xbf16>, vector<16x32xf32> -> vector<16x32xf32>
    %c0_97 = arith.constant 0 : index
    %c0_98 = arith.constant 0 : index
    %c0_99 = arith.constant 0 : index
    %164 = vector.load %arg18[%c0_97, %c0_98, %c0_99] : memref<2x1x32xf32, #tpu.memory_space<vmem>>, vector<1x1x32xf32>
    %165 = vector.shape_cast %164 : vector<1x1x32xf32> to vector<1x32xf32>
    %166 = vector.broadcast %165 : vector<1x32xf32> to vector<16x32xf32>
    %167 = arith.addf %163, %166 : vector<16x32xf32>
    %168 = arith.addf %138, %167 : vector<16x32xf32>
    %c0_100 = arith.constant 0 : index
    %c0_101 = arith.constant 0 : index
    %c0_102 = arith.constant 0 : index
    %169 = vector.load %arg19[%c0_100, %c0_101, %c0_102] : memref<2x1x32xf32, #tpu.memory_space<vmem>>, vector<1x1x32xf32>
    %170 = vector.shape_cast %169 : vector<1x1x32xf32> to vector<1x32xf32>
    %c0_103 = arith.constant 0 : index
    %c0_104 = arith.constant 0 : index
    %c0_105 = arith.constant 0 : index
    %171 = vector.load %arg20[%c0_103, %c0_104, %c0_105] : memref<2x1x32xf32, #tpu.memory_space<vmem>>, vector<1x1x32xf32>
    %172 = vector.shape_cast %171 : vector<1x1x32xf32> to vector<1x32xf32>
    %cst_106 = arith.constant dense<0.000000e+00> : vector<16xf32>
    %173 = vector.multi_reduction <add>, %168, %cst_106 [1] : vector<16x32xf32> to vector<16xf32>
    %174 = vector.shape_cast %173 : vector<16xf32> to vector<16x1xf32>
    %cst_107 = arith.constant 3.200000e+01 : f32
    %175 = vector.broadcast %cst_107 : f32 to vector<16x1xf32>
    %176 = arith.divf %174, %175 : vector<16x1xf32>
    %177 = vector.broadcast %176 : vector<16x1xf32> to vector<16x32xf32>
    %178 = arith.subf %168, %177 : vector<16x32xf32>
    %179 = arith.mulf %178, %178 : vector<16x32xf32>
    %cst_108 = arith.constant dense<0.000000e+00> : vector<16xf32>
    %180 = vector.multi_reduction <add>, %179, %cst_108 [1] : vector<16x32xf32> to vector<16xf32>
    %181 = vector.shape_cast %180 : vector<16xf32> to vector<16x1xf32>
    %cst_109 = arith.constant 3.200000e+01 : f32
    %182 = vector.broadcast %cst_109 : f32 to vector<16x1xf32>
    %183 = arith.divf %181, %182 : vector<16x1xf32>
    %cst_110 = arith.constant 9.99999996E-13 : f32
    %184 = vector.broadcast %cst_110 : f32 to vector<16x1xf32>
    %185 = arith.addf %183, %184 : vector<16x1xf32>
    %186 = math.rsqrt %185 : vector<16x1xf32>
    %187 = vector.broadcast %186 : vector<16x1xf32> to vector<16x32xf32>
    %188 = arith.mulf %178, %187 : vector<16x32xf32>
    %189 = vector.broadcast %170 : vector<1x32xf32> to vector<16x32xf32>
    %190 = arith.mulf %188, %189 : vector<16x32xf32>
    %191 = vector.broadcast %172 : vector<1x32xf32> to vector<16x32xf32>
    %192 = arith.addf %190, %191 : vector<16x32xf32>
    %193 = arith.truncf %192 : vector<16x32xf32> to vector<16x32xbf16>
    %c2 = arith.constant 2 : index
    %c0_111 = arith.constant 0 : index
    %c0_112 = arith.constant 0 : index
    %194 = vector.load %arg5[%c2, %c0_111, %c0_112] : memref<4x32x128xbf16, #tpu.memory_space<vmem>>, vector<1x32x128xbf16>
    %195 = vector.shape_cast %194 : vector<1x32x128xbf16> to vector<32x128xbf16>
    %cst_113 = arith.constant dense<0.000000e+00> : vector<16x128xf32>
    %196 = tpu.matmul %193, %195, %cst_113 {dimension_numbers = #tpu.dot_dimension_numbers<[1], [0], [0], [1], [0, 0, 1, 1], [], []>} : vector<16x32xbf16>, vector<32x128xbf16>, vector<16x128xf32> -> vector<16x128xf32>
    %c2_114 = arith.constant 2 : index
    %c0_115 = arith.constant 0 : index
    %c0_116 = arith.constant 0 : index
    %197 = vector.load %arg6[%c2_114, %c0_115, %c0_116] : memref<4x1x128xf32, #tpu.memory_space<vmem>>, vector<1x1x128xf32>
    %198 = vector.shape_cast %197 : vector<1x1x128xf32> to vector<1x128xf32>
    %199 = vector.broadcast %198 : vector<1x128xf32> to vector<16x128xf32>
    %200 = arith.addf %196, %199 : vector<16x128xf32>
    %c2_117 = arith.constant 2 : index
    %c0_118 = arith.constant 0 : index
    %c0_119 = arith.constant 0 : index
    %201 = vector.load %arg7[%c2_117, %c0_118, %c0_119] : memref<4x32x128xbf16, #tpu.memory_space<vmem>>, vector<1x32x128xbf16>
    %202 = vector.shape_cast %201 : vector<1x32x128xbf16> to vector<32x128xbf16>
    %cst_120 = arith.constant dense<0.000000e+00> : vector<16x128xf32>
    %203 = tpu.matmul %193, %202, %cst_120 {dimension_numbers = #tpu.dot_dimension_numbers<[1], [0], [0], [1], [0, 0, 1, 1], [], []>} : vector<16x32xbf16>, vector<32x128xbf16>, vector<16x128xf32> -> vector<16x128xf32>
    %c2_121 = arith.constant 2 : index
    %c0_122 = arith.constant 0 : index
    %c0_123 = arith.constant 0 : index
    %204 = vector.load %arg8[%c2_121, %c0_122, %c0_123] : memref<4x1x128xf32, #tpu.memory_space<vmem>>, vector<1x1x128xf32>
    %205 = vector.shape_cast %204 : vector<1x1x128xf32> to vector<1x128xf32>
    %206 = vector.broadcast %205 : vector<1x128xf32> to vector<16x128xf32>
    %207 = arith.addf %203, %206 : vector<16x128xf32>
    %c2_124 = arith.constant 2 : index
    %c0_125 = arith.constant 0 : index
    %c0_126 = arith.constant 0 : index
    %208 = vector.load %arg9[%c2_124, %c0_125, %c0_126] : memref<4x32x128xbf16, #tpu.memory_space<vmem>>, vector<1x32x128xbf16>
    %209 = vector.shape_cast %208 : vector<1x32x128xbf16> to vector<32x128xbf16>
    %cst_127 = arith.constant dense<0.000000e+00> : vector<16x128xf32>
    %210 = tpu.matmul %193, %209, %cst_127 {dimension_numbers = #tpu.dot_dimension_numbers<[1], [0], [0], [1], [0, 0, 1, 1], [], []>} : vector<16x32xbf16>, vector<32x128xbf16>, vector<16x128xf32> -> vector<16x128xf32>
    %c2_128 = arith.constant 2 : index
    %c0_129 = arith.constant 0 : index
    %c0_130 = arith.constant 0 : index
    %211 = vector.load %arg10[%c2_128, %c0_129, %c0_130] : memref<4x1x128xf32, #tpu.memory_space<vmem>>, vector<1x1x128xf32>
    %212 = vector.shape_cast %211 : vector<1x1x128xf32> to vector<1x128xf32>
    %213 = vector.broadcast %212 : vector<1x128xf32> to vector<16x128xf32>
    %214 = arith.addf %210, %213 : vector<16x128xf32>
    %215 = arith.truncf %200 : vector<16x128xf32> to vector<16x128xbf16>
    %216 = arith.truncf %207 : vector<16x128xf32> to vector<16x128xbf16>
    %cst_131 = arith.constant dense<0.000000e+00> : vector<16x16xf32>
    %217 = tpu.matmul %215, %216, %cst_131 {dimension_numbers = #tpu.dot_dimension_numbers<[1], [1], [0], [0], [0, 0, 1, 0], [], []>} : vector<16x128xbf16>, vector<16x128xbf16>, vector<16x16xf32> -> vector<16x16xf32>
    %218 = arith.addf %217, %0 : vector<16x16xf32>
    %cst_132 = arith.constant dense<0xFF800000> : vector<16xf32>
    %219 = vector.multi_reduction <maximumf>, %218, %cst_132 [1] : vector<16x16xf32> to vector<16xf32>
    %220 = vector.shape_cast %219 : vector<16xf32> to vector<16x1xf32>
    %221 = vector.broadcast %220 : vector<16x1xf32> to vector<16x16xf32>
    %222 = arith.subf %218, %221 : vector<16x16xf32>
    %223 = math.exp %222 : vector<16x16xf32>
    %cst_133 = arith.constant dense<0.000000e+00> : vector<16xf32>
    %224 = vector.multi_reduction <add>, %223, %cst_133 [1] : vector<16x16xf32> to vector<16xf32>
    %225 = vector.shape_cast %224 : vector<16xf32> to vector<16x1xf32>
    %226 = tpu.reciprocal %225 {approx = true} : vector<16x1xf32> -> vector<16x1xf32>
    %227 = vector.broadcast %226 : vector<16x1xf32> to vector<16x16xf32>
    %228 = arith.mulf %223, %227 : vector<16x16xf32>
    %229 = arith.truncf %228 : vector<16x16xf32> to vector<16x16xbf16>
    %230 = arith.truncf %214 : vector<16x128xf32> to vector<16x128xbf16>
    %cst_134 = arith.constant dense<0.000000e+00> : vector<16x128xf32>
    %231 = tpu.matmul %229, %230, %cst_134 {dimension_numbers = #tpu.dot_dimension_numbers<[1], [0], [0], [1], [0, 0, 1, 1], [], []>} : vector<16x16xbf16>, vector<16x128xbf16>, vector<16x128xf32> -> vector<16x128xf32>
    %c2_135 = arith.constant 2 : index
    %c0_136 = arith.constant 0 : index
    %c0_137 = arith.constant 0 : index
    %232 = vector.load %arg11[%c2_135, %c0_136, %c0_137] : memref<4x128x32xbf16, #tpu.memory_space<vmem>>, vector<1x128x32xbf16>
    %233 = vector.shape_cast %232 : vector<1x128x32xbf16> to vector<128x32xbf16>
    %234 = arith.truncf %231 : vector<16x128xf32> to vector<16x128xbf16>
    %cst_138 = arith.constant dense<0.000000e+00> : vector<16x32xf32>
    %235 = tpu.matmul %234, %233, %cst_138 {dimension_numbers = #tpu.dot_dimension_numbers<[1], [0], [0], [1], [0, 0, 1, 1], [], []>} : vector<16x128xbf16>, vector<128x32xbf16>, vector<16x32xf32> -> vector<16x32xf32>
    %c3 = arith.constant 3 : index
    %c0_139 = arith.constant 0 : index
    %c0_140 = arith.constant 0 : index
    %236 = vector.load %arg5[%c3, %c0_139, %c0_140] : memref<4x32x128xbf16, #tpu.memory_space<vmem>>, vector<1x32x128xbf16>
    %237 = vector.shape_cast %236 : vector<1x32x128xbf16> to vector<32x128xbf16>
    %cst_141 = arith.constant dense<0.000000e+00> : vector<16x128xf32>
    %238 = tpu.matmul %193, %237, %cst_141 {dimension_numbers = #tpu.dot_dimension_numbers<[1], [0], [0], [1], [0, 0, 1, 1], [], []>} : vector<16x32xbf16>, vector<32x128xbf16>, vector<16x128xf32> -> vector<16x128xf32>
    %c3_142 = arith.constant 3 : index
    %c0_143 = arith.constant 0 : index
    %c0_144 = arith.constant 0 : index
    %239 = vector.load %arg6[%c3_142, %c0_143, %c0_144] : memref<4x1x128xf32, #tpu.memory_space<vmem>>, vector<1x1x128xf32>
    %240 = vector.shape_cast %239 : vector<1x1x128xf32> to vector<1x128xf32>
    %241 = vector.broadcast %240 : vector<1x128xf32> to vector<16x128xf32>
    %242 = arith.addf %238, %241 : vector<16x128xf32>
    %c3_145 = arith.constant 3 : index
    %c0_146 = arith.constant 0 : index
    %c0_147 = arith.constant 0 : index
    %243 = vector.load %arg7[%c3_145, %c0_146, %c0_147] : memref<4x32x128xbf16, #tpu.memory_space<vmem>>, vector<1x32x128xbf16>
    %244 = vector.shape_cast %243 : vector<1x32x128xbf16> to vector<32x128xbf16>
    %cst_148 = arith.constant dense<0.000000e+00> : vector<16x128xf32>
    %245 = tpu.matmul %193, %244, %cst_148 {dimension_numbers = #tpu.dot_dimension_numbers<[1], [0], [0], [1], [0, 0, 1, 1], [], []>} : vector<16x32xbf16>, vector<32x128xbf16>, vector<16x128xf32> -> vector<16x128xf32>
    %c3_149 = arith.constant 3 : index
    %c0_150 = arith.constant 0 : index
    %c0_151 = arith.constant 0 : index
    %246 = vector.load %arg8[%c3_149, %c0_150, %c0_151] : memref<4x1x128xf32, #tpu.memory_space<vmem>>, vector<1x1x128xf32>
    %247 = vector.shape_cast %246 : vector<1x1x128xf32> to vector<1x128xf32>
    %248 = vector.broadcast %247 : vector<1x128xf32> to vector<16x128xf32>
    %249 = arith.addf %245, %248 : vector<16x128xf32>
    %c3_152 = arith.constant 3 : index
    %c0_153 = arith.constant 0 : index
    %c0_154 = arith.constant 0 : index
    %250 = vector.load %arg9[%c3_152, %c0_153, %c0_154] : memref<4x32x128xbf16, #tpu.memory_space<vmem>>, vector<1x32x128xbf16>
    %251 = vector.shape_cast %250 : vector<1x32x128xbf16> to vector<32x128xbf16>
    %cst_155 = arith.constant dense<0.000000e+00> : vector<16x128xf32>
    %252 = tpu.matmul %193, %251, %cst_155 {dimension_numbers = #tpu.dot_dimension_numbers<[1], [0], [0], [1], [0, 0, 1, 1], [], []>} : vector<16x32xbf16>, vector<32x128xbf16>, vector<16x128xf32> -> vector<16x128xf32>
    %c3_156 = arith.constant 3 : index
    %c0_157 = arith.constant 0 : index
    %c0_158 = arith.constant 0 : index
    %253 = vector.load %arg10[%c3_156, %c0_157, %c0_158] : memref<4x1x128xf32, #tpu.memory_space<vmem>>, vector<1x1x128xf32>
    %254 = vector.shape_cast %253 : vector<1x1x128xf32> to vector<1x128xf32>
    %255 = vector.broadcast %254 : vector<1x128xf32> to vector<16x128xf32>
    %256 = arith.addf %252, %255 : vector<16x128xf32>
    %257 = arith.truncf %242 : vector<16x128xf32> to vector<16x128xbf16>
    %258 = arith.truncf %249 : vector<16x128xf32> to vector<16x128xbf16>
    %cst_159 = arith.constant dense<0.000000e+00> : vector<16x16xf32>
    %259 = tpu.matmul %257, %258, %cst_159 {dimension_numbers = #tpu.dot_dimension_numbers<[1], [1], [0], [0], [0, 0, 1, 0], [], []>} : vector<16x128xbf16>, vector<16x128xbf16>, vector<16x16xf32> -> vector<16x16xf32>
    %260 = arith.addf %259, %0 : vector<16x16xf32>
    %cst_160 = arith.constant dense<0xFF800000> : vector<16xf32>
    %261 = vector.multi_reduction <maximumf>, %260, %cst_160 [1] : vector<16x16xf32> to vector<16xf32>
    %262 = vector.shape_cast %261 : vector<16xf32> to vector<16x1xf32>
    %263 = vector.broadcast %262 : vector<16x1xf32> to vector<16x16xf32>
    %264 = arith.subf %260, %263 : vector<16x16xf32>
    %265 = math.exp %264 : vector<16x16xf32>
    %cst_161 = arith.constant dense<0.000000e+00> : vector<16xf32>
    %266 = vector.multi_reduction <add>, %265, %cst_161 [1] : vector<16x16xf32> to vector<16xf32>
    %267 = vector.shape_cast %266 : vector<16xf32> to vector<16x1xf32>
    %268 = tpu.reciprocal %267 {approx = true} : vector<16x1xf32> -> vector<16x1xf32>
    %269 = vector.broadcast %268 : vector<16x1xf32> to vector<16x16xf32>
    %270 = arith.mulf %265, %269 : vector<16x16xf32>
    %271 = arith.truncf %270 : vector<16x16xf32> to vector<16x16xbf16>
    %272 = arith.truncf %256 : vector<16x128xf32> to vector<16x128xbf16>
    %cst_162 = arith.constant dense<0.000000e+00> : vector<16x128xf32>
    %273 = tpu.matmul %271, %272, %cst_162 {dimension_numbers = #tpu.dot_dimension_numbers<[1], [0], [0], [1], [0, 0, 1, 1], [], []>} : vector<16x16xbf16>, vector<16x128xbf16>, vector<16x128xf32> -> vector<16x128xf32>
    %c3_163 = arith.constant 3 : index
    %c0_164 = arith.constant 0 : index
    %c0_165 = arith.constant 0 : index
    %274 = vector.load %arg11[%c3_163, %c0_164, %c0_165] : memref<4x128x32xbf16, #tpu.memory_space<vmem>>, vector<1x128x32xbf16>
    %275 = vector.shape_cast %274 : vector<1x128x32xbf16> to vector<128x32xbf16>
    %276 = arith.truncf %273 : vector<16x128xf32> to vector<16x128xbf16>
    %cst_166 = arith.constant dense<0.000000e+00> : vector<16x32xf32>
    %277 = tpu.matmul %276, %275, %cst_166 {dimension_numbers = #tpu.dot_dimension_numbers<[1], [0], [0], [1], [0, 0, 1, 1], [], []>} : vector<16x128xbf16>, vector<128x32xbf16>, vector<16x32xf32> -> vector<16x32xf32>
    %278 = arith.addf %235, %277 : vector<16x32xf32>
    %279 = arith.addf %192, %278 : vector<16x32xf32>
    %c1_167 = arith.constant 1 : index
    %c0_168 = arith.constant 0 : index
    %c0_169 = arith.constant 0 : index
    %280 = vector.load %arg12[%c1_167, %c0_168, %c0_169] : memref<2x1x32xf32, #tpu.memory_space<vmem>>, vector<1x1x32xf32>
    %281 = vector.shape_cast %280 : vector<1x1x32xf32> to vector<1x32xf32>
    %282 = vector.broadcast %281 : vector<1x32xf32> to vector<16x32xf32>
    %283 = arith.addf %279, %282 : vector<16x32xf32>
    %c1_170 = arith.constant 1 : index
    %c0_171 = arith.constant 0 : index
    %c0_172 = arith.constant 0 : index
    %284 = vector.load %arg13[%c1_170, %c0_171, %c0_172] : memref<2x1x32xf32, #tpu.memory_space<vmem>>, vector<1x1x32xf32>
    %285 = vector.shape_cast %284 : vector<1x1x32xf32> to vector<1x32xf32>
    %c1_173 = arith.constant 1 : index
    %c0_174 = arith.constant 0 : index
    %c0_175 = arith.constant 0 : index
    %286 = vector.load %arg14[%c1_173, %c0_174, %c0_175] : memref<2x1x32xf32, #tpu.memory_space<vmem>>, vector<1x1x32xf32>
    %287 = vector.shape_cast %286 : vector<1x1x32xf32> to vector<1x32xf32>
    %cst_176 = arith.constant dense<0.000000e+00> : vector<16xf32>
    %288 = vector.multi_reduction <add>, %283, %cst_176 [1] : vector<16x32xf32> to vector<16xf32>
    %289 = vector.shape_cast %288 : vector<16xf32> to vector<16x1xf32>
    %cst_177 = arith.constant 3.200000e+01 : f32
    %290 = vector.broadcast %cst_177 : f32 to vector<16x1xf32>
    %291 = arith.divf %289, %290 : vector<16x1xf32>
    %292 = vector.broadcast %291 : vector<16x1xf32> to vector<16x32xf32>
    %293 = arith.subf %283, %292 : vector<16x32xf32>
    %294 = arith.mulf %293, %293 : vector<16x32xf32>
    %cst_178 = arith.constant dense<0.000000e+00> : vector<16xf32>
    %295 = vector.multi_reduction <add>, %294, %cst_178 [1] : vector<16x32xf32> to vector<16xf32>
    %296 = vector.shape_cast %295 : vector<16xf32> to vector<16x1xf32>
    %cst_179 = arith.constant 3.200000e+01 : f32
    %297 = vector.broadcast %cst_179 : f32 to vector<16x1xf32>
    %298 = arith.divf %296, %297 : vector<16x1xf32>
    %cst_180 = arith.constant 9.99999996E-13 : f32
    %299 = vector.broadcast %cst_180 : f32 to vector<16x1xf32>
    %300 = arith.addf %298, %299 : vector<16x1xf32>
    %301 = math.rsqrt %300 : vector<16x1xf32>
    %302 = vector.broadcast %301 : vector<16x1xf32> to vector<16x32xf32>
    %303 = arith.mulf %293, %302 : vector<16x32xf32>
    %304 = vector.broadcast %285 : vector<1x32xf32> to vector<16x32xf32>
    %305 = arith.mulf %303, %304 : vector<16x32xf32>
    %306 = vector.broadcast %287 : vector<1x32xf32> to vector<16x32xf32>
    %307 = arith.addf %305, %306 : vector<16x32xf32>
    %c1_181 = arith.constant 1 : index
    %c0_182 = arith.constant 0 : index
    %c0_183 = arith.constant 0 : index
    %308 = vector.load %arg15[%c1_181, %c0_182, %c0_183] : memref<2x32x64xbf16, #tpu.memory_space<vmem>>, vector<1x32x64xbf16>
    %309 = vector.shape_cast %308 : vector<1x32x64xbf16> to vector<32x64xbf16>
    %310 = arith.truncf %307 : vector<16x32xf32> to vector<16x32xbf16>
    %cst_184 = arith.constant dense<0.000000e+00> : vector<16x64xf32>
    %311 = tpu.matmul %310, %309, %cst_184 {dimension_numbers = #tpu.dot_dimension_numbers<[1], [0], [0], [1], [0, 0, 1, 1], [], []>} : vector<16x32xbf16>, vector<32x64xbf16>, vector<16x64xf32> -> vector<16x64xf32>
    %c1_185 = arith.constant 1 : index
    %c0_186 = arith.constant 0 : index
    %c0_187 = arith.constant 0 : index
    %312 = vector.load %arg16[%c1_185, %c0_186, %c0_187] : memref<2x1x64xf32, #tpu.memory_space<vmem>>, vector<1x1x64xf32>
    %313 = vector.shape_cast %312 : vector<1x1x64xf32> to vector<1x64xf32>
    %314 = vector.broadcast %313 : vector<1x64xf32> to vector<16x64xf32>
    %315 = arith.addf %311, %314 : vector<16x64xf32>
    %cst_188 = arith.constant 5.000000e-01 : f32
    %316 = vector.broadcast %cst_188 : f32 to vector<16x64xf32>
    %317 = arith.mulf %316, %315 : vector<16x64xf32>
    %cst_189 = arith.constant 4.471500e-02 : f32
    %318 = vector.broadcast %cst_189 : f32 to vector<16x64xf32>
    %319 = arith.mulf %318, %315 : vector<16x64xf32>
    %320 = arith.mulf %319, %315 : vector<16x64xf32>
    %321 = arith.mulf %320, %315 : vector<16x64xf32>
    %322 = arith.addf %315, %321 : vector<16x64xf32>
    %cst_190 = arith.constant 0.797884583 : f32
    %323 = vector.broadcast %cst_190 : f32 to vector<16x64xf32>
    %324 = arith.mulf %323, %322 : vector<16x64xf32>
    %325 = math.tanh %324 : vector<16x64xf32>
    %cst_191 = arith.constant 1.000000e+00 : f32
    %326 = vector.broadcast %cst_191 : f32 to vector<16x64xf32>
    %327 = arith.addf %326, %325 : vector<16x64xf32>
    %328 = arith.mulf %317, %327 : vector<16x64xf32>
    %c1_192 = arith.constant 1 : index
    %c0_193 = arith.constant 0 : index
    %c0_194 = arith.constant 0 : index
    %329 = vector.load %arg17[%c1_192, %c0_193, %c0_194] : memref<2x64x32xbf16, #tpu.memory_space<vmem>>, vector<1x64x32xbf16>
    %330 = vector.shape_cast %329 : vector<1x64x32xbf16> to vector<64x32xbf16>
    %331 = arith.truncf %328 : vector<16x64xf32> to vector<16x64xbf16>
    %cst_195 = arith.constant dense<0.000000e+00> : vector<16x32xf32>
    %332 = tpu.matmul %331, %330, %cst_195 {dimension_numbers = #tpu.dot_dimension_numbers<[1], [0], [0], [1], [0, 0, 1, 1], [], []>} : vector<16x64xbf16>, vector<64x32xbf16>, vector<16x32xf32> -> vector<16x32xf32>
    %c1_196 = arith.constant 1 : index
    %c0_197 = arith.constant 0 : index
    %c0_198 = arith.constant 0 : index
    %333 = vector.load %arg18[%c1_196, %c0_197, %c0_198] : memref<2x1x32xf32, #tpu.memory_space<vmem>>, vector<1x1x32xf32>
    %334 = vector.shape_cast %333 : vector<1x1x32xf32> to vector<1x32xf32>
    %335 = vector.broadcast %334 : vector<1x32xf32> to vector<16x32xf32>
    %336 = arith.addf %332, %335 : vector<16x32xf32>
    %337 = arith.addf %307, %336 : vector<16x32xf32>
    %c1_199 = arith.constant 1 : index
    %c0_200 = arith.constant 0 : index
    %c0_201 = arith.constant 0 : index
    %338 = vector.load %arg19[%c1_199, %c0_200, %c0_201] : memref<2x1x32xf32, #tpu.memory_space<vmem>>, vector<1x1x32xf32>
    %339 = vector.shape_cast %338 : vector<1x1x32xf32> to vector<1x32xf32>
    %c1_202 = arith.constant 1 : index
    %c0_203 = arith.constant 0 : index
    %c0_204 = arith.constant 0 : index
    %340 = vector.load %arg20[%c1_202, %c0_203, %c0_204] : memref<2x1x32xf32, #tpu.memory_space<vmem>>, vector<1x1x32xf32>
    %341 = vector.shape_cast %340 : vector<1x1x32xf32> to vector<1x32xf32>
    %cst_205 = arith.constant dense<0.000000e+00> : vector<16xf32>
    %342 = vector.multi_reduction <add>, %337, %cst_205 [1] : vector<16x32xf32> to vector<16xf32>
    %343 = vector.shape_cast %342 : vector<16xf32> to vector<16x1xf32>
    %cst_206 = arith.constant 3.200000e+01 : f32
    %344 = vector.broadcast %cst_206 : f32 to vector<16x1xf32>
    %345 = arith.divf %343, %344 : vector<16x1xf32>
    %346 = vector.broadcast %345 : vector<16x1xf32> to vector<16x32xf32>
    %347 = arith.subf %337, %346 : vector<16x32xf32>
    %348 = arith.mulf %347, %347 : vector<16x32xf32>
    %cst_207 = arith.constant dense<0.000000e+00> : vector<16xf32>
    %349 = vector.multi_reduction <add>, %348, %cst_207 [1] : vector<16x32xf32> to vector<16xf32>
    %350 = vector.shape_cast %349 : vector<16xf32> to vector<16x1xf32>
    %cst_208 = arith.constant 3.200000e+01 : f32
    %351 = vector.broadcast %cst_208 : f32 to vector<16x1xf32>
    %352 = arith.divf %350, %351 : vector<16x1xf32>
    %cst_209 = arith.constant 9.99999996E-13 : f32
    %353 = vector.broadcast %cst_209 : f32 to vector<16x1xf32>
    %354 = arith.addf %352, %353 : vector<16x1xf32>
    %355 = math.rsqrt %354 : vector<16x1xf32>
    %356 = vector.broadcast %355 : vector<16x1xf32> to vector<16x32xf32>
    %357 = arith.mulf %347, %356 : vector<16x32xf32>
    %358 = vector.broadcast %339 : vector<1x32xf32> to vector<16x32xf32>
    %359 = arith.mulf %357, %358 : vector<16x32xf32>
    %360 = vector.broadcast %341 : vector<1x32xf32> to vector<16x32xf32>
    %361 = arith.addf %359, %360 : vector<16x32xf32>
    %362 = vector.extract_strided_slice %361 {offsets = [0, 0], sizes = [1, 32], strides = [1, 1]} : vector<16x32xf32> to vector<1x32xf32>
    %363 = vector.extract_strided_slice %361 {offsets = [8, 0], sizes = [1, 32], strides = [1, 1]} : vector<16x32xf32> to vector<1x32xf32>
    %364 = tpu.concatenate %362, %363 in 0 : vector<1x32xf32>, vector<1x32xf32> -> vector<2x32xf32>
    %c0_210 = arith.constant 0 : index
    %c0_211 = arith.constant 0 : index
    %365 = vector.load %arg21[%c0_210, %c0_211] : memref<32x32xbf16, #tpu.memory_space<vmem>>, vector<32x32xbf16>
    %366 = arith.truncf %364 : vector<2x32xf32> to vector<2x32xbf16>
    %cst_212 = arith.constant dense<0.000000e+00> : vector<2x32xf32>
    %367 = tpu.matmul %366, %365, %cst_212 {dimension_numbers = #tpu.dot_dimension_numbers<[1], [0], [0], [1], [0, 0, 1, 1], [], []>} : vector<2x32xbf16>, vector<32x32xbf16>, vector<2x32xf32> -> vector<2x32xf32>
    %c0_213 = arith.constant 0 : index
    %c0_214 = arith.constant 0 : index
    %368 = vector.load %arg22[%c0_213, %c0_214] : memref<1x32xf32, #tpu.memory_space<vmem>>, vector<1x32xf32>
    %369 = vector.broadcast %368 : vector<1x32xf32> to vector<2x32xf32>
    %370 = arith.addf %367, %369 : vector<2x32xf32>
    %371 = math.tanh %370 : vector<2x32xf32>
    %c0_215 = arith.constant 0 : index
    %c0_216 = arith.constant 0 : index
    %372 = vector.load %arg23[%c0_215, %c0_216] : memref<32x256xbf16, #tpu.memory_space<vmem>>, vector<32x256xbf16>
    %373 = arith.truncf %371 : vector<2x32xf32> to vector<2x32xbf16>
    %cst_217 = arith.constant dense<0.000000e+00> : vector<2x256xf32>
    %374 = tpu.matmul %373, %372, %cst_217 {dimension_numbers = #tpu.dot_dimension_numbers<[1], [0], [0], [1], [0, 0, 1, 1], [], []>} : vector<2x32xbf16>, vector<32x256xbf16>, vector<2x256xf32> -> vector<2x256xf32>
    %c0_218 = arith.constant 0 : index
    %c0_219 = arith.constant 0 : index
    %375 = vector.load %arg2[%c0_218, %c0_219] : memref<2x16xf32, #tpu.memory_space<vmem>>, vector<2x16xf32>
    %c0_220 = arith.constant 0 : index
    %c0_221 = arith.constant 0 : index
    %376 = vector.load %arg24[%c0_220, %c0_221] : memref<16x256xbf16, #tpu.memory_space<vmem>>, vector<16x256xbf16>
    %377 = arith.truncf %375 : vector<2x16xf32> to vector<2x16xbf16>
    %cst_222 = arith.constant dense<0.000000e+00> : vector<2x256xf32>
    %378 = tpu.matmul %377, %376, %cst_222 {dimension_numbers = #tpu.dot_dimension_numbers<[1], [0], [0], [1], [0, 0, 1, 1], [], []>} : vector<2x16xbf16>, vector<16x256xbf16>, vector<2x256xf32> -> vector<2x256xf32>
    %379 = arith.addf %374, %378 : vector<2x256xf32>
    %c0_223 = arith.constant 0 : index
    %c0_224 = arith.constant 0 : index
    %380 = vector.load %arg25[%c0_223, %c0_224] : memref<1x256xf32, #tpu.memory_space<vmem>>, vector<1x256xf32>
    %381 = vector.broadcast %380 : vector<1x256xf32> to vector<2x256xf32>
    %382 = arith.addf %379, %381 : vector<2x256xf32>
    %cst_225 = arith.constant 0.000000e+00 : f32
    %383 = vector.broadcast %cst_225 : f32 to vector<2x256xf32>
    %384 = arith.maximumf %382, %383 : vector<2x256xf32>
    %c0_226 = arith.constant 0 : index
    %c0_227 = arith.constant 0 : index
    %385 = vector.load %arg26[%c0_226, %c0_227] : memref<256x128xbf16, #tpu.memory_space<vmem>>, vector<256x128xbf16>
    %386 = arith.truncf %384 : vector<2x256xf32> to vector<2x256xbf16>
    %cst_228 = arith.constant dense<0.000000e+00> : vector<2x128xf32>
    %387 = tpu.matmul %386, %385, %cst_228 {dimension_numbers = #tpu.dot_dimension_numbers<[1], [0], [0], [1], [0, 0, 1, 1], [], []>} : vector<2x256xbf16>, vector<256x128xbf16>, vector<2x128xf32> -> vector<2x128xf32>
    %c0_229 = arith.constant 0 : index
    %c0_230 = arith.constant 0 : index
    %388 = vector.load %arg27[%c0_229, %c0_230] : memref<1x128xf32, #tpu.memory_space<vmem>>, vector<1x128xf32>
    %389 = vector.broadcast %388 : vector<1x128xf32> to vector<2x128xf32>
    %390 = arith.addf %387, %389 : vector<2x128xf32>
    %c0_231 = arith.constant 0 : index
    %c0_232 = arith.constant 0 : index
    %391 = vector.load %arg28[%c0_231, %c0_232] : memref<2x128xf32, #tpu.memory_space<vmem>>, vector<2x128xf32>
    tpu.vector_store %arg28[%c0_231, %c0_232], %390 {strides = array<i32>} : memref<2x128xf32, #tpu.memory_space<vmem>>, vector<2x128xf32>,
    return
  }
}

</mosaic_0001>

<bundles_post_ra>
// kernel: forward.1
= control target key start
LH: loop header
LB: loop body
LE: loop exit
PB: predicated region body
PF: predicated region fallthrough
CT: control target
= control target key end

     0   :  { %s4401_s0 = inlined_call_operand.vmem [shape: f32[16,32], index: 0, kind: input, shape index: {}]   ;;  %s4402_s1 = inlined_call_operand.vmem [shape: f32[16,16], index: 1, kind: input, shape index: {}]   ;;  %s4403_s2 = inlined_call_operand.vmem [shape: f32[2,16], index: 2, kind: input, shape index: {}]   ;;  %s4404_s3 = inlined_call_operand.vmem [shape: f32[1,32], index: 3, kind: input, shape index: {}]   ;;  %s4405_s4 = inlined_call_operand.vmem [shape: f32[1,32], index: 4, kind: input, shape index: {}]   ;;  %s4406_s5 = inlined_call_operand.vmem [shape: bf16[4,32,128], index: 5, kind: input, shape index: {}]   ;;  %s4407_s6 = inlined_call_operand.vmem [shape: f32[4,1,128], index: 6, kind: input, shape index: {}]   ;;  %s4408_s7 = inlined_call_operand.vmem [shape: bf16[4,32,128], index: 7, kind: input, shape index: {}]   ;;  %s4409_s8 = inlined_call_operand.vmem [shape: f32[4,1,128], index: 8, kind: input, shape index: {}]   ;;  %s4410_s9 = inlined_call_operand.vmem [shape: bf16[4,32,128], index: 9, kind: input, shape index: {}]   ;;  %s4411_s10 = inlined_call_operand.vmem [shape: f32[4,1,128], index: 10, kind: input, shape index: {}]   ;;  %s4412_s11 = inlined_call_operand.vmem [shape: bf16[4,128,32], index: 11, kind: input, shape index: {}]   ;;  %s4413_s12 = inlined_call_operand.vmem [shape: f32[2,1,32], index: 12, kind: input, shape index: {}]   ;;  %s4414_s13 = inlined_call_operand.vmem [shape: f32[2,1,32], index: 13, kind: input, shape index: {}]   ;;  %s4415_s14 = inlined_call_operand.vmem [shape: f32[2,1,32], index: 14, kind: input, shape index: {}]   ;;  %s4416_s15 = inlined_call_operand.vmem [shape: bf16[2,32,64], index: 15, kind: input, shape index: {}]   ;;  %s4417_s16 = inlined_call_operand.vmem [shape: f32[2,1,64], index: 16, kind: input, shape index: {}]   ;;  %s4418_s17 = inlined_call_operand.vmem [shape: bf16[2,64,32], index: 17, kind: input, shape index: {}]   ;;  %s4419_s18 = inlined_call_operand.vmem [shape: f32[2,1,32], index: 18, kind: input, shape index: {}]   ;;  %s4420_s19 = inlined_call_operand.vmem [shape: f32[2,1,32], index: 19, kind: input, shape index: {}]   ;;  %s4421_s20 = inlined_call_operand.vmem [shape: f32[2,1,32], index: 20, kind: input, shape index: {}]   ;;  %s4422_s21 = inlined_call_operand.vmem [shape: bf16[32,32], index: 21, kind: input, shape index: {}]   ;;  %s4423_s22 = inlined_call_operand.vmem [shape: f32[1,32], index: 22, kind: input, shape index: {}]   ;;  %s4424_s23 = inlined_call_operand.vmem [shape: bf16[32,256], index: 23, kind: input, shape index: {}]   ;;  %s4425_s24 = inlined_call_operand.vmem [shape: bf16[16,256], index: 24, kind: input, shape index: {}]   ;;  %s4426_s25 = inlined_call_operand.vmem [shape: f32[1,256], index: 25, kind: input, shape index: {}]   ;;  %s4427_s26 = inlined_call_operand.vmem [shape: bf16[256,128], index: 26, kind: input, shape index: {}]   ;;  %s4428_s27 = inlined_call_operand.vmem [shape: f32[1,128], index: 27, kind: input, shape index: {}]   ;;  %s4429_s28 = inlined_call_operand.hbm [shape: f32[2,128], index: 28, kind: output, shape index: {}]  }
   0x1   :  { %4440 = sst [smem:[#allocation5_spill]] %s4401_s0 }
   0x2   :  { %4441 = sst [smem:[#allocation6_spill]] %s4402_s1 }
   0x3   :  { %4442 = sst [smem:[#allocation7_spill]] %s4403_s2 }
   0x4   :  { %4443 = sst [smem:[#allocation8_spill]] %s4404_s3 }
   0x5   :  { %4444 = sst [smem:[#allocation9_spill]] %s4405_s4 }
   0x6   :  { %4445 = sst [smem:[#allocation10_spill]] %s4406_s5 }
   0x7   :  { %4446 = sst [smem:[#allocation11_spill]] %s4407_s6 }
   0x8   :  { %4447 = sst [smem:[#allocation12_spill]] %s4408_s7 }
   0x9   :  { %4448 = sst [smem:[#allocation13_spill]] %s4409_s8 }
   0xa   :  { %4449 = sst [smem:[#allocation14_spill]] %s4410_s9 }
   0xb   :  { %4450 = sst [smem:[#allocation15_spill]] %s4411_s10 }
   0xc   :  { %4451 = sst [smem:[#allocation16_spill]] %s4412_s11 }
   0xd   :  { %4452 = sst [smem:[#allocation17_spill]] %s4413_s12 }
   0xe   :  { %4453 = sst [smem:[#allocation18_spill]] %s4429_s28 }
   0xf   :  { %s4454_s9 = sld [smem:[#allocation5_spill]]  ;;  %vm97_vm0 = vcmask 261120  }
  0x15   :  { %v93_v0 = vld [vmem:[%s4454_s9] sm:$0xff]  ;;  %v94_v1 = vld [vmem:[%s4454_s9 + $0x8] sm:$0xff] }
  0x16   :  { %v98_v2 = vsel %vm97_vm0, %v93_v0, 0.0  ;;  %v101_v3 = vsel %vm97_vm0, %v94_v1, 0.0 }
  0x17   :  { %99 = vadd.xlane.f32.xlu0 %v98_v2 }
  0x1b   :  { %102 = vadd.xlane.f32.xlu0 %v101_v3 }
  0x1c   :  { %33 = vsyncpa [#allocation3], 0  ;;  %s4455_s0 = sld [smem:[#allocation10_spill]]  ;;  %v3608_v15 = vmov 0.0   ;;  %vm3609_vm1 = vmmov 0   ;;  %vm380_vm2 = vcmask 130048  }
  0x1d   :  { %3153 = vmatprep.subr.bf16.mxu0 %v3608_v15  ;;  %3177 = vmatprep.subr.bf16.mxu1 %v3608_v15  ;;  %s4456_s12 = sld [smem:[#allocation8_spill]]  ;;  %vm1152_vm3 = vcmask 523264   ;;  %vm2362_vm4 = vcmask 1040384  }
  0x1e   :  { %3157 = vmatprep.mubr.msk.bf16.mxu0 %vm3609_vm1, %v3608_v15  ;;  %3179 = vmatprep.mubr.msk.bf16.mxu1 %vm3609_vm1, %v3608_v15  ;;  %s4457_s8 = sld [smem:[#allocation9_spill]] }
  0x1f   :  { %s4458_s30 = sld [smem:[#allocation12_spill]] }
  0x20   :  { %s4459_s29 = sld [smem:[#allocation14_spill]] }
  0x21   :  { %s4460_s4 = sld [smem:[#allocation13_spill]] }
  0x22   :  { %v3429_v14 = vld [vmem:[%s4455_s0 + $0x8] sm:$0xff]   ;;  %v3430_v16 = vld [vmem:[%s4455_s0] sm:$0xff]   ;;  %s4461_s9 = sld [smem:[#allocation11_spill]]  ;;  %v3435_v59 = vld [vmem:[%s4455_s0 + $0x18] sm:$0xff]  }
  0x23   :  { %3154 = vmatpush3.bf16.msra.mxu0 %v3429_v14  ;;  %v2767_v25 = vld [vmem:[%s4456_s12] ss:$0 sm:$0xff]  ;;  %s4462_s10 = sld [smem:[#allocation15_spill]]  ;;  %v3436_v63 = vld [vmem:[%s4455_s0 + $0x10] sm:$0xff]  }
  0x24   :  { %3155 = vmatprep.subr.bf16.mxu0 %v3608_v15  ;;  %v2768_v29 = vld [vmem:[%s4457_s8] ss:$0 sm:$0xff]  ;;  %s4463_s2 = sld [smem:[#allocation6_spill]] }
  0x25   :  { %v3431_v33 = vld [vmem:[%s4458_s30 + $0x8] sm:$0xff]   ;;  %v3432_v35 = vld [vmem:[%s4458_s30] sm:$0xff]   ;;  %s4464_s3 = sld [smem:[#allocation16_spill]] }
  0x26   :  { %v3433_v36 = vld [vmem:[%s4459_s29 + $0x8] sm:$0xff]   ;;  %v3434_v37 = vld [vmem:[%s4459_s29] sm:$0xff]   ;;  %s4465_s6 = sld [smem:[#allocation17_spill]] }
  0x27   :  { %3156 = vmatpush3.bf16.msra.mxu0 %v3430_v16  ;;  %v2773_v43 = vld [vmem:[%s4460_s4] ss:$0 sm:$0xff] }
  0x28   :  { %3161 = vmatprep.subr.bf16.mxu0 %v3608_v15  ;;  %v2769_v51 = vld [vmem:[%s4461_s9] ss:$0 sm:$0xff] }
  0x29   :  { %v2777_v53 = vld [vmem:[%s4462_s10] ss:$0 sm:$0xff] }
  0x2a   :  { %v3863_v2 = vld [vmem:[%s4463_s2] sm:$0xff] }
  0xa0   :  { %v100_v4 = vpop.xlane.xlu0 %99 }
  0xa1   :  { %v105_v5 = vmul.f32 0.03125, %v100_v4 }
  0xa3   :  { %v107_v6 = vsub.f32 %v93_v0, %v105_v5  ;;  %v3437_v0 = vld [vmem:[%s4459_s29 + $0x18] sm:$0xff]  }
  0xa4   :  { %v103_v7 = vpop.xlane.xlu0 %102 }
  0xa5   :  { %v106_v8 = vmul.f32 0.03125, %v103_v7  ;;  %v109_v9 = vmul.f32 %v107_v6, %v107_v6 }
  0xa7   :  { %v108_v10 = vsub.f32 %v94_v1, %v106_v8  ;;  %v111_v11 = vsel %vm97_vm0, %v109_v9, 0.0  ;;  %v3438_v1 = vld [vmem:[%s4459_s29 + $0x10] sm:$0xff]  }
  0xa8   :  { %112 = vadd.xlane.f32.xlu1 %v111_v11 }
  0xa9   :  { %v110_v12 = vmul.f32 %v108_v10, %v108_v10 }
  0xab   :  { %v114_v13 = vsel %vm97_vm0, %v110_v12, 0.0 }
  0xac   :  { %115 = vadd.xlane.f32.xlu1 %v114_v13  ;;  %v2787_v13 = vld [vmem:[%s4461_s9 + $0x1] ss:$0 sm:$0xff] }
 0x131   :  { %v113_v17 = vpop.xlane.xlu1 %112 }
 0x132   :  { %v117_v18 = vmul.f32 0.03125, %v113_v17 }
 0x134   :  { %v119_v19 = vadd.f32 1e-12, %v117_v18 }
 0x135   :  { %v116_v20 = vpop.xlane.xlu1 %115 }
 0x136   :  { %3524 = vrsqrt.f32 %v119_v19  ;;  %v118_v21 = vmul.f32 0.03125, %v116_v20 }
 0x138   :  { %v120_v22 = vadd.f32 1e-12, %v118_v21 }
 0x13a   :  { %3526 = vrsqrt.f32 %v120_v22  ;;  %v2805_v22 = vld [vmem:[%s4462_s10 + $0x1] ss:$0 sm:$0xff] }
 0x143   :  { %v3525_v23 = vpop.eup %3524 }
 0x144   :  { %v123_v24 = vmul.f32 %v3525_v23, %v107_v6  ;;  %v3869_v6 = vld [vmem:[%s4463_s2 + $0x8] sm:$0xff] }
 0x146   :  { %v131_v27 = vmul.f32 %v2767_v25, %v123_v24 }
 0x147   :  { %v3527_v26 = vpop.eup %3526 }
 0x148   :  { %v124_v28 = vmul.f32 %v3527_v26, %v108_v10  ;;  %v3787_v31 = vadd.f32 %v2768_v29, %v131_v27 }
 0x14a   :  { %v132_v30 = vmul.f32 %v2767_v25, %v124_v28 }
 0x14c   :  { %v3789_v32 = vadd.f32 %v2768_v29, %v132_v30 }
 0x14e   :  { %v3796_v34 = vpack.c.bf16 %v3789_v32, %v3787_v31 }
 0x150   :  { %3158 = vmatmul.mubr.msk.bf16.vlgmr.msra.gmra.mxu0 %vm97_vm0, %v3796_v34 }
 0x151   :  { %3162 = vmatpush3.bf16.msra.mxu0 %v3431_v33  ;;  %3165 = vmatprep.mubr.msk.bf16.mxu0 %vm3609_vm1, %v3608_v15 }
 0x152   :  { %3163 = vmatprep.subr.bf16.mxu0 %v3608_v15 }
 0x155   :  { %3164 = vmatpush3.bf16.msra.mxu0 %v3432_v35 }
 0x156   :  { %3169 = vmatprep.subr.bf16.mxu0 %v3608_v15 }
 0x158   :  { %3166 = vmatmul.mubr.msk.bf16.vlgmr.msra.gmra.mxu0 %vm97_vm0, %v3796_v34 }
 0x159   :  { %3170 = vmatpush3.bf16.msra.mxu0 %v3433_v36  ;;  %3173 = vmatprep.mubr.msk.bf16.mxu0 %vm3609_vm1, %v3608_v15 }
 0x15a   :  { %3171 = vmatprep.subr.bf16.mxu0 %v3608_v15 }
 0x15d   :  { %3172 = vmatpush3.bf16.msra.mxu0 %v3434_v37 }
 0x15e   :  { %3183 = vmatprep.subr.bf16.mxu0 %v3608_v15 }
 0x160   :  { %3174 = vmatmul.mubr.msk.bf16.vlgmr.msra.gmra.mxu0 %vm97_vm0, %v3796_v34 }
 0x161   :  { %3185 = vmatprep.mubr.msk.bf16.mxu0 %vm3609_vm1, %v3608_v15 }
 0x210   :  { %v202_v38 = vpop.f32.mrf.mxu0 }
 0x211   :  { %v203_v55 = vadd.f32 %v2769_v51, %v202_v38 }
 0x212   :  { %v3159_v39 = vpop.f32.mrf.mxu0 }
 0x214   :  { %v205_v40 = vpop.f32.mrf.mxu0 }
 0x215   :  { %v206_v52 = vadd.f32 %v2769_v51, %v205_v40 }
 0x216   :  { %v3160_v41 = vpop.f32.mrf.mxu0 }
 0x217   :  { %v337_v60 = vpack.c.bf16 %v206_v52, %v203_v55 }
 0x218   :  { %v266_v42 = vpop.f32.mrf.mxu0 }
 0x219   :  { %v267_v46 = vadd.f32 %v2773_v43, %v266_v42 }
 0x21a   :  { %v3167_v44 = vpop.f32.mrf.mxu0 }
 0x21c   :  { %v269_v45 = vpop.f32.mrf.mxu0 }
 0x21d   :  { %v270_v47 = vadd.f32 %v2773_v43, %v269_v45 }
 0x21e   :  { %v3168_v48 = vpop.f32.mrf.mxu0 }
 0x21f   :  { %v338_v49 = vpack.c.bf16 %v270_v47, %v267_v46  ;;  %v3439_v48 = vld [vmem:[%s4458_s30 + $0x18] sm:$0xff]  }
 0x220   :  { %v330_v50 = vpop.f32.mrf.mxu0 }
 0x221   :  { %3178 = vmatpush3.bf16.xpose.msra.mxu1 %v338_v49  ;;  %v331_v57 = vadd.f32 %v2777_v53, %v330_v50  ;;  %v3440_v50 = vld [vmem:[%s4458_s30 + $0x10] sm:$0xff]  }
 0x222   :  { %v3175_v54 = vpop.f32.mrf.mxu0  ;;  %3189 = vmatprep.subr.bf16.mxu1 %v3608_v15 }
 0x224   :  { %v333_v56 = vpop.f32.mrf.mxu0 }
 0x225   :  { %v334_v58 = vadd.f32 %v2777_v53, %v333_v56 }
 0x226   :  { %v3176_v61 = vpop.f32.mrf.mxu0 }
 0x227   :  { %v404_v62 = vpack.c.bf16 %v334_v58, %v331_v57  ;;  %v2796_v57 = vld [vmem:[%s4460_s4 + $0x1] ss:$0 sm:$0xff] }
 0x228   :  { %3180 = vmatmul.mubr.bf16.vlgmr.msra.gmra.mxu1 %v337_v60 }
 0x229   :  { %3184 = vmatpush3.bf16.msra.mxu0 %v404_v62  ;;  %3190 = vmatpush3.bf16.msra.mxu1 %v3435_v59 }
 0x22a   :  { %3191 = vmatprep.subr.bf16.mxu1 %v3608_v15  ;;  %3193 = vmatprep.mubr.msk.bf16.mxu1 %vm3609_vm1, %v3608_v15 }
 0x22b   :  { %3197 = vmatprep.subr.bf16.mxu0 %v3608_v15 }
 0x22d   :  { %3192 = vmatpush3.bf16.msra.mxu1 %v3436_v63 }
 0x22e   :  { %3205 = vmatprep.subr.bf16.mxu1 %v3608_v15 }
 0x230   :  { %3194 = vmatmul.mubr.msk.bf16.vlgmr.msra.gmra.mxu1 %vm97_vm0, %v3796_v34 }
 0x231   :  { %3206 = vmatpush3.bf16.msra.mxu1 %v3437_v0  ;;  %3209 = vmatprep.mubr.msk.bf16.mxu1 %vm3609_vm1, %v3608_v15 }
 0x232   :  { %3207 = vmatprep.subr.bf16.mxu1 %v3608_v15 }
 0x235   :  { %3208 = vmatpush3.bf16.msra.mxu1 %v3438_v1 }
 0x236   :  { %3219 = vmatprep.subr.bf16.mxu1 %v3608_v15 }
 0x238   :  { %3210 = vmatmul.mubr.msk.bf16.vlgmr.msra.gmra.mxu1 %vm97_vm0, %v3796_v34 }
 0x239   :  { %3221 = vmatprep.mubr.msk.bf16.mxu1 %vm3609_vm1, %v3608_v15 }
 0x2e8   :  { %v373_v3 = vpop.f32.mrf.mxu1 }
 0x2e9   :  { %v374_v4 = vadd.f32 %v373_v3, %v3863_v2 }
 0x2ea   :  { %v3181_v5 = vpop.f32.mrf.mxu1 }
 0x2eb   :  { %v381_v7 = vsel %vm380_vm2, %v374_v4, -inf }
 0x2ec   :  { %v376_v8 = vpop.f32.mrf.mxu1  ;;  %382 = vmax.xlane.f32.xlu0 %v381_v7 }
 0x2ed   :  { %v377_v9 = vadd.f32 %v376_v8, %v3869_v6 }
 0x2ee   :  { %v3182_v10 = vpop.f32.mrf.mxu1 }
 0x2ef   :  { %v384_v11 = vsel %vm380_vm2, %v377_v9, -inf }
 0x2f0   :  { %v525_v12 = vpop.f32.mrf.mxu1  ;;  %385 = vmax.xlane.f32.xlu1 %v384_v11 }
 0x2f1   :  { %v526_v17 = vadd.f32 %v2787_v13, %v525_v12 }
 0x2f2   :  { %v3195_v14 = vpop.f32.mrf.mxu1 }
 0x2f4   :  { %v528_v16 = vpop.f32.mrf.mxu1 }
 0x2f5   :  { %v529_v18 = vadd.f32 %v2787_v13, %v528_v16 }
 0x2f6   :  { %v3196_v19 = vpop.f32.mrf.mxu1 }
 0x2f7   :  { %v664_v20 = vpack.c.bf16 %v529_v18, %v526_v17 }
 0x2f8   :  { %v657_v21 = vpop.f32.mrf.mxu1 }
 0x2f9   :  { %v658_v25 = vadd.f32 %v2805_v22, %v657_v21  ;;  %v3450_v21 = vld [vmem:[%s4464_s3 + $0x70] sm:$0xff]  }
 0x2fa   :  { %v3211_v23 = vpop.f32.mrf.mxu1 }
 0x2fb   :  { %v3452_v23 = vld [vmem:[%s4464_s3 + $0x60] sm:$0xff]  }
 0x2fc   :  { %v660_v24 = vpop.f32.mrf.mxu1 }
 0x2fd   :  { %v661_v26 = vadd.f32 %v2805_v22, %v660_v24  ;;  %v3451_v22 = vld [vmem:[%s4464_s3 + $0x68] sm:$0xff]   ;;  %v3453_v24 = vld [vmem:[%s4464_s3 + $0x58] sm:$0xff]  }
 0x2fe   :  { %v3212_v27 = vpop.f32.mrf.mxu1 }
 0x2ff   :  { %v730_v28 = vpack.c.bf16 %v661_v26, %v658_v25  ;;  %v3454_v25 = vld [vmem:[%s4464_s3 + $0x50] sm:$0xff]  }
 0x301   :  { %3220 = vmatpush3.bf16.msra.mxu1 %v730_v28 }
 0x302   :  { %3245 = vmatprep.subr.bf16.mxu1 %v3608_v15 }
 0x375   :  { %v383_v29 = vpop.xlane.xlu0 %382 }
 0x376   :  { %v387_v30 = vsub.f32 %v374_v4, %v383_v29 }
 0x378   :  { %v389_v33 = vmul.f32 1.442695, %v387_v30 }
 0x379   :  { %v386_v35 = vpop.xlane.xlu1 %385 }
 0x37a   :  { %3528 = vpow2.f32 %v389_v33  ;;  %v388_v36 = vsub.f32 %v377_v9, %v386_v35  ;;  %v3441_v35 = vld [vmem:[%s4464_s3 + $0x38] sm:$0xff]  }
 0x37c   :  { %v391_v37 = vmul.f32 1.442695, %v388_v36 }
 0x37e   :  { %3530 = vpow2.f32 %v391_v37  ;;  %v3442_v37 = vld [vmem:[%s4464_s3 + $0x30] sm:$0xff]  }
 0x387   :  { %v3529_v38 = vpop.eup %3528 }
 0x388   :  { %v393_v39 = vsel %vm380_vm2, %v3529_v38, 0.0 }
 0x389   :  { %394 = vadd.xlane.f32.xlu0 %v393_v39  ;;  %v3444_v39 = vld [vmem:[%s4464_s3 + $0x20] sm:$0xff]  }
 0x38b   :  { %v3531_v40 = vpop.eup %3530 }
 0x38c   :  { %v396_v41 = vsel %vm380_vm2, %v3531_v40, 0.0 }
 0x38d   :  { %397 = vadd.xlane.f32.xlu1 %v396_v41  ;;  %v3446_v41 = vld [vmem:[%s4464_s3 + $0x10] sm:$0xff]  }
 0x412   :  { %v395_v42 = vpop.xlane.xlu0 %394 }
 0x413   :  { %3532 = vrcp.f32 %v395_v42  ;;  %v3447_v42 = vld [vmem:[%s4464_s3 + $0x8] sm:$0xff]  }
 0x416   :  { %v398_v43 = vpop.xlane.xlu1 %397 }
 0x417   :  { %3534 = vrcp.f32 %v398_v43  ;;  %v3448_v43 = vld [vmem:[%s4464_s3] sm:$0xff]  }
 0x420   :  { %v3533_v44 = vpop.eup %3532 }
 0x421   :  { %v401_v46 = vmul.f32 %v3533_v44, %v3529_v38  ;;  %v3443_v38 = vld [vmem:[%s4464_s3 + $0x28] sm:$0xff]  }
 0x422   :  { %v3455_v44 = vld [vmem:[%s4464_s3 + $0x48] sm:$0xff]  }
 0x424   :  { %v3535_v45 = vpop.eup %3534 }
 0x425   :  { %v402_v47 = vmul.f32 %v3535_v45, %v3531_v40  ;;  %v3445_v40 = vld [vmem:[%s4464_s3 + $0x18] sm:$0xff]   ;;  %v3456_v45 = vld [vmem:[%s4464_s3 + $0x40] sm:$0xff]  }
 0x427   :  { %v403_v49 = vpack.c.bf16 %v402_v47, %v401_v46 }
 0x429   :  { %3186 = vmatmul.mubr.msk.bf16.vlgmr.msra.gmra.mxu0 %vm380_vm2, %v403_v49 }
 0x42a   :  { %3198 = vmatpush3.bf16.msra.mxu0 %v3439_v48  ;;  %3201 = vmatprep.mubr.msk.bf16.mxu0 %vm3609_vm1, %v3608_v15 }
 0x42b   :  { %3199 = vmatprep.subr.bf16.mxu0 %v3608_v15 }
 0x42e   :  { %3200 = vmatpush3.bf16.msra.mxu0 %v3440_v50 }
 0x42f   :  { %3213 = vmatprep.subr.bf16.mxu0 %v3608_v15 }
 0x431   :  { %3202 = vmatmul.mubr.msk.bf16.vlgmr.msra.gmra.mxu0 %vm97_vm0, %v3796_v34 }
 0x432   :  { %3215 = vmatprep.mubr.msk.bf16.mxu0 %vm3609_vm1, %v3608_v15 }
 0x4e9   :  { %v3898_v51 = vpop.f32.mrf.mxu0 }
 0x4eb   :  { %v3187_v52 = vpop.f32.mrf.mxu0 }
 0x4ed   :  { %v3900_v53 = vpop.f32.mrf.mxu0 }
 0x4ee   :  { %v465_v54 = vpack.c.bf16 %v3900_v53, %v3898_v51 }
 0x4ef   :  { %v3188_v55 = vpop.f32.mrf.mxu0 }
 0x4f1   :  { %v591_v56 = vpop.f32.mrf.mxu0 }
 0x4f2   :  { %v592_v34 = vadd.f32 %v2796_v57, %v591_v56 }
 0x4f3   :  { %v3203_v58 = vpop.f32.mrf.mxu0 }
 0x4f4   :  { %v2842_v58 = vld [vmem:[%s4465_s6] ss:$0 sm:$0xff] }
 0x4f5   :  { %v594_v59 = vpop.f32.mrf.mxu0 }
 0x4f6   :  { %v595_v60 = vadd.f32 %v2796_v57, %v594_v59 }
 0x4f7   :  { %v3204_v61 = vpop.f32.mrf.mxu0 }
 0x4f8   :  { %v665_v62 = vpack.c.bf16 %v595_v60, %v592_v34 }
 0x4fa   :  { %3214 = vmatpush3.bf16.xpose.msra.mxu0 %v665_v62 }
 0x4fb   :  { %3225 = vmatprep.subr.bf16.mxu0 %v3608_v15 }
 0x501   :  { %3216 = vmatmul.mubr.bf16.vlgmr.msra.gmra.mxu0 %v664_v20  ;;  %v3449_v20 = vld [vmem:[%s4464_s3 + $0x78] sm:$0xff]  }
 0x502   :  { %3241 = vmatprep.mubr.msk.bf16.mxu0 %vm3609_vm1, %v3608_v15  ;;  %3226 = vmatpush3.bf16.msra.mxu0 %v3449_v20 }
 0x503   :  { %3227 = vmatprep.subr.bf16.mxu0 %v3608_v15 }
 0x506   :  { %3228 = vmatpush3.bf16.msra.mxu0 %v3450_v21 }
 0x507   :  { %3229 = vmatprep.subr.bf16.mxu0 %v3608_v15 }
 0x50a   :  { %3230 = vmatpush3.bf16.msra.mxu0 %v3451_v22 }
 0x50b   :  { %3231 = vmatprep.subr.bf16.mxu0 %v3608_v15 }
 0x50e   :  { %3232 = vmatpush3.bf16.msra.mxu0 %v3452_v23 }
 0x50f   :  { %3233 = vmatprep.subr.bf16.mxu0 %v3608_v15 }
 0x512   :  { %3234 = vmatpush3.bf16.msra.mxu0 %v3453_v24  ;;  %v2843_v24 = vld [vmem:[%s4414_s13] ss:$0 sm:$0xff] }
 0x513   :  { %3235 = vmatprep.subr.bf16.mxu0 %v3608_v15 }
 0x516   :  { %3236 = vmatpush3.bf16.msra.mxu0 %v3454_v25 }
 0x517   :  { %3237 = vmatprep.subr.bf16.mxu0 %v3608_v15 }
 0x51a   :  { %3238 = vmatpush3.bf16.msra.mxu0 %v3455_v44 }
 0x51b   :  { %3239 = vmatprep.subr.bf16.mxu0 %v3608_v15 }
 0x51e   :  { %3240 = vmatpush3.bf16.msra.mxu0 %v3456_v45 }
 0x51f   :  { %3265 = vmatprep.subr.bf16.mxu0 %v3608_v15 }
 0x5c1   :  { %v700_v63 = vpop.f32.mrf.mxu0 }
 0x5c2   :  { %v701_v0 = vadd.f32 %v700_v63, %v3863_v2 }
 0x5c3   :  { %v3217_v1 = vpop.f32.mrf.mxu0 }
 0x5c4   :  { %v707_v3 = vsel %vm380_vm2, %v701_v0, -inf }
 0x5c5   :  { %708 = vmax.xlane.f32.xlu0 %v707_v3  ;;  %v703_v4 = vpop.f32.mrf.mxu0 }
 0x5c6   :  { %v704_v5 = vadd.f32 %v703_v4, %v3869_v6 }
 0x5c7   :  { %v3218_v7 = vpop.f32.mrf.mxu0 }
 0x5c8   :  { %v710_v8 = vsel %vm380_vm2, %v704_v5, -inf }
 0x5c9   :  { %711 = vmax.xlane.f32.xlu1 %v710_v8 }
 0x64e   :  { %v709_v9 = vpop.xlane.xlu0 %708 }
 0x64f   :  { %v713_v10 = vsub.f32 %v701_v0, %v709_v9 }
 0x651   :  { %v715_v11 = vmul.f32 1.442695, %v713_v10 }
 0x652   :  { %v712_v12 = vpop.xlane.xlu1 %711 }
 0x653   :  { %3536 = vpow2.f32 %v715_v11  ;;  %v714_v13 = vsub.f32 %v704_v5, %v712_v12 }
 0x655   :  { %v717_v14 = vmul.f32 1.442695, %v714_v13  ;;  %v3457_v13 = vld [vmem:[%s4416_s15 + $0x8] sm:$0xff]  }
 0x657   :  { %3538 = vpow2.f32 %v717_v14  ;;  %v3458_v14 = vld [vmem:[%s4416_s15] sm:$0xff]  }
 0x660   :  { %v3537_v16 = vpop.eup %3536 }
 0x661   :  { %v719_v17 = vsel %vm380_vm2, %v3537_v16, 0.0 }
 0x662   :  { %720 = vadd.xlane.f32.xlu0 %v719_v17 }
 0x664   :  { %v3539_v18 = vpop.eup %3538 }
 0x665   :  { %v722_v19 = vsel %vm380_vm2, %v3539_v18, 0.0 }
 0x666   :  { %723 = vadd.xlane.f32.xlu1 %v722_v19 }
 0x6eb   :  { %v721_v26 = vpop.xlane.xlu0 %720 }
 0x6ec   :  { %3540 = vrcp.f32 %v721_v26 }
 0x6ef   :  { %v724_v27 = vpop.xlane.xlu1 %723 }
 0x6f0   :  { %3542 = vrcp.f32 %v724_v27 }
 0x6f9   :  { %v3541_v28 = vpop.eup %3540 }
 0x6fa   :  { %v727_v30 = vmul.f32 %v3541_v28, %v3537_v16  ;;  %v2844_v28 = vld [vmem:[%s4415_s14] ss:$0 sm:$0xff] }
 0x6fd   :  { %v3543_v29 = vpop.eup %3542 }
 0x6fe   :  { %v728_v33 = vmul.f32 %v3543_v29, %v3539_v18 }
 0x700   :  { %v729_v36 = vpack.c.bf16 %v728_v33, %v727_v30 }
 0x702   :  { %3222 = vmatmul.mubr.msk.bf16.vlgmr.msra.gmra.mxu1 %vm380_vm2, %v729_v36  ;;  %v3459_v36 = vld [vmem:[%s4418_s17 + $0x18] sm:$0xff]  }
 0x703   :  { %3246 = vmatpush3.bf16.msra.mxu1 %v3441_v35  ;;  %3261 = vmatprep.mubr.msk.bf16.mxu1 %vm3609_vm1, %v3608_v15 }
 0x704   :  { %3247 = vmatprep.subr.bf16.mxu1 %v3608_v15 }
 0x707   :  { %3248 = vmatpush3.bf16.msra.mxu1 %v3442_v37  ;;  %v3460_v37 = vld [vmem:[%s4418_s17 + $0x10] sm:$0xff]  }
 0x708   :  { %3249 = vmatprep.subr.bf16.mxu1 %v3608_v15 }
 0x70b   :  { %3250 = vmatpush3.bf16.msra.mxu1 %v3443_v38  ;;  %v3461_v38 = vld [vmem:[%s4418_s17 + $0x8] sm:$0xff]  }
 0x70c   :  { %3251 = vmatprep.subr.bf16.mxu1 %v3608_v15 }
 0x70f   :  { %3252 = vmatpush3.bf16.msra.mxu1 %v3444_v39  ;;  %v3462_v39 = vld [vmem:[%s4418_s17] sm:$0xff]  }
 0x710   :  { %3253 = vmatprep.subr.bf16.mxu1 %v3608_v15 }
 0x713   :  { %3254 = vmatpush3.bf16.msra.mxu1 %v3445_v40  ;;  %v2845_v40 = vld [vmem:[%s4417_s16] ss:$0 sm:$0xff] }
 0x714   :  { %3255 = vmatprep.subr.bf16.mxu1 %v3608_v15 }
 0x717   :  { %3256 = vmatpush3.bf16.msra.mxu1 %v3446_v41 }
 0x718   :  { %3257 = vmatprep.subr.bf16.mxu1 %v3608_v15 }
 0x71b   :  { %3258 = vmatpush3.bf16.msra.mxu1 %v3447_v42 }
 0x71c   :  { %3259 = vmatprep.subr.bf16.mxu1 %v3608_v15 }
 0x71f   :  { %3260 = vmatpush3.bf16.msra.mxu1 %v3448_v43 }
 0x720   :  { %3273 = vmatprep.subr.bf16.mxu1 %v3608_v15 }
 0x722   :  { %3262 = vmatmul.mubr.bf16.vlgmr.msra.gmra.mxu1 %v465_v54 }
 0x723   :  { %3281 = vmatprep.mubr.msk.bf16.mxu1 %vm3609_vm1, %v3608_v15  ;;  %3274 = vmatpush3.bf16.msra.mxu1 %v3459_v36 }
 0x724   :  { %3275 = vmatprep.subr.bf16.mxu1 %v3608_v15 }
 0x727   :  { %3276 = vmatpush3.bf16.msra.mxu1 %v3460_v37 }
 0x728   :  { %3277 = vmatprep.subr.bf16.mxu1 %v3608_v15 }
 0x72b   :  { %3278 = vmatpush3.bf16.msra.mxu1 %v3461_v38  ;;  %v2855_v38 = vld [vmem:[%s4420_s19] ss:$0 sm:$0xff] }
 0x72c   :  { %3279 = vmatprep.subr.bf16.mxu1 %v3608_v15 }
 0x72f   :  { %3280 = vmatpush3.bf16.msra.mxu1 %v3462_v39 }
 0x730   :  { %3301 = vmatprep.subr.bf16.mxu1 %v3608_v15 }
 0x7c2   :  { %v768_v46 = vpop.f32.mrf.mxu1 }
 0x7c4   :  { %v3223_v47 = vpop.f32.mrf.mxu1 }
 0x7c6   :  { %v771_v48 = vpop.f32.mrf.mxu1 }
 0x7c7   :  { %v792_v49 = vpack.c.bf16 %v771_v48, %v768_v46 }
 0x7c8   :  { %v3224_v50 = vpop.f32.mrf.mxu1 }
 0x7c9   :  { %3242 = vmatmul.mubr.bf16.vlgmr.msra.gmra.mxu0 %v792_v49 }
 0x7ca   :  { %3269 = vmatprep.mubr.msk.bf16.mxu0 %vm3609_vm1, %v3608_v15  ;;  %3266 = vmatpush3.bf16.msra.mxu0 %v3457_v13 }
 0x7cb   :  { %3267 = vmatprep.subr.bf16.mxu0 %v3608_v15 }
 0x7ce   :  { %3268 = vmatpush3.bf16.msra.mxu0 %v3458_v14 }
 0x7cf   :  { %3285 = vmatprep.subr.bf16.mxu0 %v3608_v15 }
 0x7e2   :  { %v964_v51 = vpop.f32.mrf.mxu1 }
 0x7e4   :  { %v3263_v52 = vpop.f32.mrf.mxu1 }
 0x7e6   :  { %v967_v53 = vpop.f32.mrf.mxu1 }
 0x7e8   :  { %v3264_v54 = vpop.f32.mrf.mxu1 }
 0x889   :  { %v875_v55 = vpop.f32.mrf.mxu0 }
 0x88a   :  { %v965_v56 = vadd.f32 %v964_v51, %v875_v55 }
 0x88b   :  { %v3243_v57 = vpop.f32.mrf.mxu0 }
 0x88c   :  { %v971_v59 = vadd.f32 %v965_v56, %v3787_v31 }
 0x88d   :  { %v878_v34 = vpop.f32.mrf.mxu0 }
 0x88e   :  { %v968_v60 = vadd.f32 %v967_v53, %v878_v34  ;;  %v980_v61 = vadd.f32 %v2842_v58, %v971_v59 }
 0x88f   :  { %v3244_v62 = vpop.f32.mrf.mxu0 }
 0x890   :  { %v972_v63 = vadd.f32 %v968_v60, %v3789_v32  ;;  %v984_v0 = vsel %vm97_vm0, %v980_v61, 0.0 }
 0x891   :  { %985 = vadd.xlane.f32.xlu0 %v984_v0 }
 0x892   :  { %v981_v1 = vadd.f32 %v2842_v58, %v972_v63 }
 0x894   :  { %v987_v3 = vsel %vm97_vm0, %v981_v1, 0.0 }
 0x895   :  { %988 = vadd.xlane.f32.xlu1 %v987_v3 }
 0x91a   :  { %v986_v4 = vpop.xlane.xlu0 %985 }
 0x91b   :  { %v990_v5 = vmul.f32 0.03125, %v986_v4 }
 0x91d   :  { %v992_v7 = vsub.f32 %v980_v61, %v990_v5 }
 0x91e   :  { %v989_v8 = vpop.xlane.xlu1 %988 }
 0x91f   :  { %v991_v9 = vmul.f32 0.03125, %v989_v8  ;;  %v994_v10 = vmul.f32 %v992_v7, %v992_v7 }
 0x921   :  { %v993_v31 = vsub.f32 %v981_v1, %v991_v9  ;;  %v996_v11 = vsel %vm97_vm0, %v994_v10, 0.0  ;;  %v2849_v1 = vld [vmem:[%s4419_s18] ss:$0 sm:$0xff] }
 0x922   :  { %997 = vadd.xlane.f32.xlu0 %v996_v11 }
 0x923   :  { %v995_v12 = vmul.f32 %v993_v31, %v993_v31 }
 0x925   :  { %v999_v32 = vsel %vm97_vm0, %v995_v12, 0.0 }
 0x926   :  { %1000 = vadd.xlane.f32.xlu1 %v999_v32 }
 0x9ab   :  { %v998_v16 = vpop.xlane.xlu0 %997 }
 0x9ac   :  { %v1002_v17 = vmul.f32 0.03125, %v998_v16 }
 0x9ae   :  { %v1004_v18 = vadd.f32 1e-12, %v1002_v17 }
 0x9af   :  { %v1001_v19 = vpop.xlane.xlu1 %1000 }
 0x9b0   :  { %3544 = vrsqrt.f32 %v1004_v18  ;;  %v1003_v20 = vmul.f32 0.03125, %v1001_v19 }
 0x9b2   :  { %v1005_v21 = vadd.f32 1e-12, %v1003_v20 }
 0x9b4   :  { %3546 = vrsqrt.f32 %v1005_v21 }
 0x9bd   :  { %v3545_v22 = vpop.eup %3544 }
 0x9be   :  { %v1008_v23 = vmul.f32 %v3545_v22, %v992_v7 }
 0x9c0   :  { %v1016_v27 = vmul.f32 %v2843_v24, %v1008_v23  ;;  %v3463_v23 = vld [vmem:[%s4455_s0 + $0x28] sm:$0xff]  }
 0x9c1   :  { %v3547_v25 = vpop.eup %3546 }
 0x9c2   :  { %v1009_v26 = vmul.f32 %v3547_v25, %v993_v31  ;;  %v1024_v30 = vadd.f32 %v2844_v28, %v1016_v27  ;;  %v3465_v25 = vld [vmem:[%s4455_s0 + $0x20] sm:$0xff]  }
 0x9c4   :  { %v1017_v29 = vmul.f32 %v2843_v24, %v1009_v26  ;;  %v3464_v24 = vld [vmem:[%s4459_s29 + $0x28] sm:$0xff]   ;;  %v3466_v26 = vld [vmem:[%s4459_s29 + $0x20] sm:$0xff]  }
 0x9c6   :  { %v1025_v33 = vadd.f32 %v2844_v28, %v1017_v29 }
 0x9c8   :  { %v1030_v35 = vpack.c.bf16 %v1025_v33, %v1024_v30 }
 0x9ca   :  { %3270 = vmatmul.mubr.msk.bf16.vlgmr.msra.gmra.mxu0 %vm97_vm0, %v1030_v35 }
 0x9cb   :  { %3289 = vmatprep.mubr.msk.bf16.mxu0 %vm3609_vm1, %v3608_v15  ;;  %3286 = vmatpush3.bf16.msra.mxu0 %v3463_v23 }
 0x9cc   :  { %3287 = vmatprep.subr.bf16.mxu0 %v3608_v15 }
 0x9cf   :  { %3288 = vmatpush3.bf16.msra.mxu0 %v3465_v25 }
 0x9d0   :  { %3293 = vmatprep.subr.bf16.mxu0 %v3608_v15 }
 0xa8a   :  { %v1087_v41 = vpop.f32.mrf.mxu0 }
 0xa8b   :  { %v1088_v42 = vadd.f32 %v2845_v40, %v1087_v41 }
 0xa8c   :  { %v3271_v43 = vpop.f32.mrf.mxu0 }
 0xa8d   :  { %v1096_v44 = vmul.f32 0.044715, %v1088_v42  ;;  %v1094_v34 = vmul.f32 0.5, %v1088_v42 }
 0xa8e   :  { %v1090_v45 = vpop.f32.mrf.mxu0 }
 0xa8f   :  { %v1098_v46 = vmul.f32 %v1096_v44, %v1088_v42  ;;  %v1091_v47 = vadd.f32 %v2845_v40, %v1090_v45 }
 0xa90   :  { %v3272_v48 = vpop.f32.mrf.mxu0 }
 0xa91   :  { %v1100_v49 = vmul.f32 %v1098_v46, %v1088_v42  ;;  %v1097_v50 = vmul.f32 0.044715, %v1091_v47  ;;  %v1095_v60 = vmul.f32 0.5, %v1091_v47  ;;  %v3467_v46 = vld [vmem:[%s4458_s30 + $0x28] sm:$0xff]   ;;  %v3468_v48 = vld [vmem:[%s4458_s30 + $0x20] sm:$0xff]  }
 0xa93   :  { %v1102_v51 = vadd.f32 %v1100_v49, %v1088_v42  ;;  %v1099_v52 = vmul.f32 %v1097_v50, %v1091_v47  ;;  %v2856_v42 = vld [vmem:[%s4421_s20] ss:$0 sm:$0xff] }
 0xa95   :  { %v1104_v53 = vmul.f32 0.7978846, %v1102_v51  ;;  %v1101_v54 = vmul.f32 %v1099_v52, %v1091_v47  ;;  %v2880_v51 = vld [vmem:[%s4462_s10 + $0x2] ss:$0 sm:$0xff] }
 0xa97   :  { %3548 = vtanh.f32 %v1104_v53  ;;  %v1103_v55 = vadd.f32 %v1101_v54, %v1091_v47 }
 0xa99   :  { %v1105_v56 = vmul.f32 0.7978846, %v1103_v55 }
 0xa9b   :  { %3550 = vtanh.f32 %v1105_v56 }
 0xaa4   :  { %v3549_v57 = vpop.eup %3548 }
 0xaa5   :  { %v1108_v58 = vadd.f32 1.0, %v3549_v57 }
 0xaa7   :  { %v1110_v62 = vmul.f32 %v1108_v58, %v1094_v34 }
 0xaa8   :  { %v3551_v59 = vpop.eup %3550 }
 0xaa9   :  { %v1109_v61 = vadd.f32 1.0, %v3551_v59 }
 0xaab   :  { %v1111_v63 = vmul.f32 %v1109_v61, %v1095_v60  ;;  %v2871_v61 = vld [vmem:[%s4460_s4 + $0x2] ss:$0 sm:$0xff] }
 0xaad   :  { %v1120_v0 = vpack.c.bf16 %v1111_v63, %v1110_v62 }
 0xaaf   :  { %3282 = vmatmul.mubr.msk.bf16.vlgmr.msra.gmra.mxu1 %vm1152_vm3, %v1120_v0 }
 0xab0   :  { %3305 = vmatprep.mubr.msk.bf16.mxu1 %vm3609_vm1, %v3608_v15  ;;  %3302 = vmatpush3.bf16.msra.mxu1 %v3464_v24 }
 0xab1   :  { %3303 = vmatprep.subr.bf16.mxu1 %v3608_v15 }
 0xab4   :  { %3304 = vmatpush3.bf16.msra.mxu1 %v3466_v26 }
 0xab5   :  { %3315 = vmatprep.subr.bf16.mxu1 %v3608_v15 }
 0xb6f   :  { %v1190_v3 = vpop.f32.mrf.mxu1 }
 0xb70   :  { %v1191_v4 = vadd.f32 %v2849_v1, %v1190_v3 }
 0xb71   :  { %v3283_v5 = vpop.f32.mrf.mxu1 }
 0xb72   :  { %v1197_v7 = vadd.f32 %v1191_v4, %v1024_v30  ;;  %v2862_v5 = vld [vmem:[%s4461_s9 + $0x2] ss:$0 sm:$0xff] }
 0xb73   :  { %v1193_v8 = vpop.f32.mrf.mxu1 }
 0xb74   :  { %v1194_v9 = vadd.f32 %v2849_v1, %v1193_v8  ;;  %v1201_v10 = vsel %vm97_vm0, %v1197_v7, 0.0 }
 0xb75   :  { %1202 = vadd.xlane.f32.xlu0 %v1201_v10  ;;  %v3284_v31 = vpop.f32.mrf.mxu1 }
 0xb76   :  { %v1198_v11 = vadd.f32 %v1194_v9, %v1025_v33  ;;  %v3469_v9 = vld [vmem:[%s4455_s0 + $0x38] sm:$0xff]   ;;  %v3470_v31 = vld [vmem:[%s4455_s0 + $0x30] sm:$0xff]  }
 0xb78   :  { %v1204_v12 = vsel %vm97_vm0, %v1198_v11, 0.0 }
 0xb79   :  { %1205 = vadd.xlane.f32.xlu1 %v1204_v12  ;;  %v3472_v12 = vld [vmem:[%s4459_s29 + $0x30] sm:$0xff]  }
 0xbfe   :  { %v1203_v32 = vpop.xlane.xlu0 %1202 }
 0xbff   :  { %v1207_v13 = vmul.f32 0.03125, %v1203_v32 }
 0xc01   :  { %v1209_v14 = vsub.f32 %v1197_v7, %v1207_v13 }
 0xc02   :  { %v1206_v16 = vpop.xlane.xlu1 %1205 }
 0xc03   :  { %v1208_v17 = vmul.f32 0.03125, %v1206_v16  ;;  %v1211_v18 = vmul.f32 %v1209_v14, %v1209_v14 }
 0xc05   :  { %v1210_v19 = vsub.f32 %v1198_v11, %v1208_v17  ;;  %v1213_v20 = vsel %vm97_vm0, %v1211_v18, 0.0  ;;  %v3471_v11 = vld [vmem:[%s4459_s29 + $0x38] sm:$0xff]  }
 0xc06   :  { %1214 = vadd.xlane.f32.xlu0 %v1213_v20 }
 0xc07   :  { %v1212_v21 = vmul.f32 %v1210_v19, %v1210_v19 }
 0xc09   :  { %v1216_v22 = vsel %vm97_vm0, %v1212_v21, 0.0 }
 0xc0a   :  { %1217 = vadd.xlane.f32.xlu1 %v1216_v22  ;;  %v2906_v22 = vld [vmem:[%s4461_s9 + $0x3] ss:$0 sm:$0xff] }
 0xc8f   :  { %v1215_v27 = vpop.xlane.xlu0 %1214 }
 0xc90   :  { %v1219_v28 = vmul.f32 0.03125, %v1215_v27 }
 0xc92   :  { %v1221_v29 = vadd.f32 1e-12, %v1219_v28 }
 0xc93   :  { %v1218_v30 = vpop.xlane.xlu1 %1217 }
 0xc94   :  { %3552 = vrsqrt.f32 %v1221_v29  ;;  %v1220_v33 = vmul.f32 0.03125, %v1218_v30  ;;  %v2924_v30 = vld [vmem:[%s4462_s10 + $0x3] ss:$0 sm:$0xff] }
 0xc96   :  { %v1222_v35 = vadd.f32 1e-12, %v1220_v33 }
 0xc98   :  { %3554 = vrsqrt.f32 %v1222_v35 }
 0xca1   :  { %v3553_v36 = vpop.eup %3552 }
 0xca2   :  { %v1225_v37 = vmul.f32 %v3553_v36, %v1209_v14 }
 0xca4   :  { %v1233_v40 = vmul.f32 %v2855_v38, %v1225_v37 }
 0xca5   :  { %v3555_v39 = vpop.eup %3554 }
 0xca6   :  { %v1226_v41 = vmul.f32 %v3555_v39, %v1210_v19  ;;  %v4067_v44 = vadd.f32 %v2856_v42, %v1233_v40 }
 0xca8   :  { %v1234_v43 = vmul.f32 %v2855_v38, %v1226_v41 }
 0xcaa   :  { %v4069_v45 = vadd.f32 %v2856_v42, %v1234_v43 }
 0xcac   :  { %v4076_v47 = vpack.c.bf16 %v4069_v45, %v4067_v44 }
 0xcae   :  { %3290 = vmatmul.mubr.msk.bf16.vlgmr.msra.gmra.mxu0 %vm97_vm0, %v4076_v47  ;;  %3306 = vmatmul.mubr.msk.bf16.vlgmr.msra.gmra.mxu1 %vm97_vm0, %v4076_v47 }
 0xcaf   :  { %3294 = vmatpush3.bf16.msra.mxu0 %v3467_v46  ;;  %3297 = vmatprep.mubr.msk.bf16.mxu0 %vm3609_vm1, %v3608_v15 }
 0xcb0   :  { %3295 = vmatprep.subr.bf16.mxu0 %v3608_v15  ;;  %3317 = vmatprep.mubr.msk.bf16.mxu1 %vm3609_vm1, %v3608_v15 }
 0xcb3   :  { %3296 = vmatpush3.bf16.msra.mxu0 %v3468_v48 }
 0xcb4   :  { %3309 = vmatprep.subr.bf16.mxu0 %v3608_v15 }
 0xcb6   :  { %3298 = vmatmul.mubr.msk.bf16.vlgmr.msra.gmra.mxu0 %vm97_vm0, %v4076_v47 }
 0xcb7   :  { %3311 = vmatprep.mubr.msk.bf16.mxu0 %vm3609_vm1, %v3608_v15 }
 0xd6e   :  { %v1306_v49 = vpop.f32.mrf.mxu0  ;;  %v1438_v50 = vpop.f32.mrf.mxu1 }
 0xd6f   :  { %v1439_v56 = vadd.f32 %v2880_v51, %v1438_v50  ;;  %v1307_v8 = vadd.f32 %v2862_v5, %v1306_v49 }
 0xd70   :  { %v3291_v52 = vpop.f32.mrf.mxu0  ;;  %v3307_v53 = vpop.f32.mrf.mxu1 }
 0xd72   :  { %v1309_v54 = vpop.f32.mrf.mxu0  ;;  %v1441_v55 = vpop.f32.mrf.mxu1 }
 0xd73   :  { %v1442_v57 = vadd.f32 %v2880_v51, %v1441_v55  ;;  %v1310_v7 = vadd.f32 %v2862_v5, %v1309_v54 }
 0xd74   :  { %v3292_v58 = vpop.f32.mrf.mxu0  ;;  %v3308_v59 = vpop.f32.mrf.mxu1 }
 0xd75   :  { %v1511_v34 = vpack.c.bf16 %v1442_v57, %v1439_v56  ;;  %v1445_v10 = vpack.c.bf16 %v1310_v7, %v1307_v8  ;;  %v3473_v59 = vld [vmem:[%s4458_s30 + $0x38] sm:$0xff]  }
 0xd76   :  { %v1372_v60 = vpop.f32.mrf.mxu0 }
 0xd77   :  { %3316 = vmatpush3.bf16.msra.mxu1 %v1511_v34  ;;  %v1373_v0 = vadd.f32 %v2871_v61, %v1372_v60  ;;  %v3474_v60 = vld [vmem:[%s4458_s30 + $0x30] sm:$0xff]  }
 0xd78   :  { %v3299_v62 = vpop.f32.mrf.mxu0  ;;  %3329 = vmatprep.subr.bf16.mxu1 %v3608_v15 }
 0xd7a   :  { %v1375_v63 = vpop.f32.mrf.mxu0 }
 0xd7b   :  { %v1376_v1 = vadd.f32 %v2871_v61, %v1375_v63 }
 0xd7c   :  { %v3300_v3 = vpop.f32.mrf.mxu0 }
 0xd7d   :  { %v1446_v4 = vpack.c.bf16 %v1376_v1, %v1373_v0 }
 0xd7f   :  { %3310 = vmatpush3.bf16.xpose.msra.mxu0 %v1446_v4  ;;  %v2915_v4 = vld [vmem:[%s4460_s4 + $0x3] ss:$0 sm:$0xff]  ;;  %s4466_s4 = sld [smem:[#allocation7_spill]] }
 0xd80   :  { %3321 = vmatprep.subr.bf16.mxu0 %v3608_v15 }
 0xd86   :  { %3312 = vmatmul.mubr.bf16.vlgmr.msra.gmra.mxu0 %v1445_v10 }
 0xd87   :  { %3322 = vmatpush3.bf16.msra.mxu0 %v3469_v9  ;;  %3325 = vmatprep.mubr.msk.bf16.mxu0 %vm3609_vm1, %v3608_v15 }
 0xd88   :  { %3323 = vmatprep.subr.bf16.mxu0 %v3608_v15 }
 0xd8b   :  { %3324 = vmatpush3.bf16.msra.mxu0 %v3470_v31 }
 0xd8c   :  { %3337 = vmatprep.subr.bf16.mxu0 %v3608_v15 }
 0xd8e   :  { %3326 = vmatmul.mubr.msk.bf16.vlgmr.msra.gmra.mxu0 %vm97_vm0, %v4076_v47 }
 0xd8f   :  { %3338 = vmatpush3.bf16.msra.mxu0 %v3471_v11  ;;  %3341 = vmatprep.mubr.msk.bf16.mxu0 %vm3609_vm1, %v3608_v15 }
 0xd90   :  { %3339 = vmatprep.subr.bf16.mxu0 %v3608_v15 }
 0xd93   :  { %3340 = vmatpush3.bf16.msra.mxu0 %v3472_v12 }
 0xd94   :  { %3351 = vmatprep.subr.bf16.mxu0 %v3608_v15 }
 0xd96   :  { %3342 = vmatmul.mubr.msk.bf16.vlgmr.msra.gmra.mxu0 %vm97_vm0, %v4076_v47 }
 0xd97   :  { %3353 = vmatprep.mubr.msk.bf16.mxu0 %vm3609_vm1, %v3608_v15 }
 0xe46   :  { %v1481_v32 = vpop.f32.mrf.mxu0 }
 0xe47   :  { %v1482_v13 = vadd.f32 %v1481_v32, %v3863_v2 }
 0xe48   :  { %v3313_v14 = vpop.f32.mrf.mxu0 }
 0xe49   :  { %v1488_v16 = vsel %vm380_vm2, %v1482_v13, -inf }
 0xe4a   :  { %1489 = vmax.xlane.f32.xlu0 %v1488_v16  ;;  %v1484_v17 = vpop.f32.mrf.mxu0 }
 0xe4b   :  { %v1485_v18 = vadd.f32 %v1484_v17, %v3869_v6 }
 0xe4c   :  { %v3314_v19 = vpop.f32.mrf.mxu0 }
 0xe4d   :  { %v1491_v20 = vsel %vm380_vm2, %v1485_v18, -inf }
 0xe4e   :  { %1492 = vmax.xlane.f32.xlu1 %v1491_v20  ;;  %v1633_v21 = vpop.f32.mrf.mxu0 }
 0xe4f   :  { %v1634_v25 = vadd.f32 %v2906_v22, %v1633_v21 }
 0xe50   :  { %v3327_v23 = vpop.f32.mrf.mxu0 }
 0xe52   :  { %v1636_v24 = vpop.f32.mrf.mxu0 }
 0xe53   :  { %v1637_v26 = vadd.f32 %v2906_v22, %v1636_v24 }
 0xe54   :  { %v3328_v27 = vpop.f32.mrf.mxu0 }
 0xe55   :  { %v1772_v28 = vpack.c.bf16 %v1637_v26, %v1634_v25  ;;  %v3484_v27 = vld [vmem:[%s4464_s3 + $0xf0] sm:$0xff]  }
 0xe56   :  { %v1765_v29 = vpop.f32.mrf.mxu0 }
 0xe57   :  { %v1766_v36 = vadd.f32 %v2924_v30, %v1765_v29  ;;  %v3486_v29 = vld [vmem:[%s4464_s3 + $0xe0] sm:$0xff]  }
 0xe58   :  { %v3343_v33 = vpop.f32.mrf.mxu0 }
 0xe59   :  { %v3488_v33 = vld [vmem:[%s4464_s3 + $0xd0] sm:$0xff]  }
 0xe5a   :  { %v1768_v35 = vpop.f32.mrf.mxu0 }
 0xe5b   :  { %v1769_v37 = vadd.f32 %v2924_v30, %v1768_v35  ;;  %v3487_v30 = vld [vmem:[%s4464_s3 + $0xd8] sm:$0xff]  }
 0xe5c   :  { %v3344_v38 = vpop.f32.mrf.mxu0 }
 0xe5d   :  { %v1838_v39 = vpack.c.bf16 %v1769_v37, %v1766_v36 }
 0xe5f   :  { %3352 = vmatpush3.bf16.msra.mxu0 %v1838_v39 }
 0xe60   :  { %3377 = vmatprep.subr.bf16.mxu0 %v3608_v15 }
 0xed3   :  { %v1490_v40 = vpop.xlane.xlu0 %1489 }
 0xed4   :  { %v1494_v41 = vsub.f32 %v1482_v13, %v1490_v40 }
 0xed6   :  { %v1496_v42 = vmul.f32 1.442695, %v1494_v41  ;;  %v3475_v41 = vld [vmem:[%s4464_s3 + $0xb8] sm:$0xff]  }
 0xed7   :  { %v1493_v43 = vpop.xlane.xlu1 %1492 }
 0xed8   :  { %3556 = vpow2.f32 %v1496_v42  ;;  %v1495_v46 = vsub.f32 %v1485_v18, %v1493_v43  ;;  %v3476_v43 = vld [vmem:[%s4464_s3 + $0xb0] sm:$0xff]  }
 0xeda   :  { %v1498_v48 = vmul.f32 1.442695, %v1495_v46  ;;  %v3477_v46 = vld [vmem:[%s4464_s3 + $0xa8] sm:$0xff]  }
 0xedc   :  { %3558 = vpow2.f32 %v1498_v48  ;;  %v3478_v48 = vld [vmem:[%s4464_s3 + $0xa0] sm:$0xff]  }
 0xee5   :  { %v3557_v49 = vpop.eup %3556 }
 0xee6   :  { %v1500_v50 = vsel %vm380_vm2, %v3557_v49, 0.0 }
 0xee7   :  { %1501 = vadd.xlane.f32.xlu0 %v1500_v50  ;;  %v3480_v50 = vld [vmem:[%s4464_s3 + $0x90] sm:$0xff]  }
 0xee9   :  { %v3559_v51 = vpop.eup %3558 }
 0xeea   :  { %v1503_v52 = vsel %vm380_vm2, %v3559_v51, 0.0 }
 0xeeb   :  { %1504 = vadd.xlane.f32.xlu1 %v1503_v52  ;;  %v3482_v52 = vld [vmem:[%s4464_s3 + $0x80] sm:$0xff]  }
 0xf70   :  { %v1502_v53 = vpop.xlane.xlu0 %1501 }
 0xf71   :  { %3560 = vrcp.f32 %v1502_v53  ;;  %v3489_v53 = vld [vmem:[%s4464_s3 + $0xc8] sm:$0xff]  }
 0xf74   :  { %v1505_v54 = vpop.xlane.xlu1 %1504 }
 0xf75   :  { %3562 = vrcp.f32 %v1505_v54  ;;  %v3490_v54 = vld [vmem:[%s4464_s3 + $0xc0] sm:$0xff]  }
 0xf7e   :  { %v3561_v55 = vpop.eup %3560 }
 0xf7f   :  { %v1508_v57 = vmul.f32 %v3561_v55, %v3557_v49  ;;  %v3479_v49 = vld [vmem:[%s4464_s3 + $0x98] sm:$0xff]  }
 0xf82   :  { %v3563_v56 = vpop.eup %3562 }
 0xf83   :  { %v1509_v58 = vmul.f32 %v3563_v56, %v3559_v51  ;;  %v3481_v51 = vld [vmem:[%s4464_s3 + $0x88] sm:$0xff]  }
 0xf85   :  { %v1510_v34 = vpack.c.bf16 %v1509_v58, %v1508_v57 }
 0xf87   :  { %3318 = vmatmul.mubr.msk.bf16.vlgmr.msra.gmra.mxu1 %vm380_vm2, %v1510_v34 }
 0xf88   :  { %3330 = vmatpush3.bf16.msra.mxu1 %v3473_v59  ;;  %3333 = vmatprep.mubr.msk.bf16.mxu1 %vm3609_vm1, %v3608_v15 }
 0xf89   :  { %3331 = vmatprep.subr.bf16.mxu1 %v3608_v15 }
 0xf8c   :  { %3332 = vmatpush3.bf16.msra.mxu1 %v3474_v60 }
 0xf8d   :  { %3345 = vmatprep.subr.bf16.mxu1 %v3608_v15 }
 0xf8f   :  { %3334 = vmatmul.mubr.msk.bf16.vlgmr.msra.gmra.mxu1 %vm97_vm0, %v4076_v47 }
 0xf90   :  { %3347 = vmatprep.mubr.msk.bf16.mxu1 %vm3609_vm1, %v3608_v15 }
0x1047   :  { %v4160_v61 = vpop.f32.mrf.mxu1 }
0x1049   :  { %v3319_v62 = vpop.f32.mrf.mxu1 }
0x104b   :  { %v4162_v63 = vpop.f32.mrf.mxu1 }
0x104c   :  { %v1573_v0 = vpack.c.bf16 %v4162_v63, %v4160_v61 }
0x104d   :  { %v3320_v1 = vpop.f32.mrf.mxu1 }
0x104f   :  { %v1699_v3 = vpop.f32.mrf.mxu1 }
0x1050   :  { %v1700_v47 = vadd.f32 %v2915_v4, %v1699_v3  ;;  %v2962_v3 = vld [vmem:[%s4465_s6 + $0x1] ss:$0 sm:$0xff] }
0x1051   :  { %v3335_v5 = vpop.f32.mrf.mxu1 }
0x1053   :  { %v1702_v7 = vpop.f32.mrf.mxu1 }
0x1054   :  { %v1703_v8 = vadd.f32 %v2915_v4, %v1702_v7 }
0x1055   :  { %v3336_v9 = vpop.f32.mrf.mxu1 }
0x1056   :  { %v1773_v10 = vpack.c.bf16 %v1703_v8, %v1700_v47 }
0x1058   :  { %3346 = vmatpush3.bf16.xpose.msra.mxu1 %v1773_v10 }
0x1059   :  { %3357 = vmatprep.subr.bf16.mxu1 %v3608_v15 }
0x105f   :  { %3348 = vmatmul.mubr.bf16.vlgmr.msra.gmra.mxu1 %v1772_v28  ;;  %v3485_v28 = vld [vmem:[%s4464_s3 + $0xe8] sm:$0xff]  }
0x1060   :  { %3373 = vmatprep.mubr.msk.bf16.mxu1 %vm3609_vm1, %v3608_v15 }
0x111f   :  { %v1808_v31 = vpop.f32.mrf.mxu1 }
0x1120   :  { %v1809_v11 = vadd.f32 %v1808_v31, %v3863_v2 }
0x1121   :  { %v3349_v12 = vpop.f32.mrf.mxu1 }
0x1122   :  { %v1815_v32 = vsel %vm380_vm2, %v1809_v11, -inf }
0x1123   :  { %1816 = vmax.xlane.f32.xlu0 %v1815_v32  ;;  %v1811_v13 = vpop.f32.mrf.mxu1 }
0x1124   :  { %v1812_v14 = vadd.f32 %v1811_v13, %v3869_v6  ;;  %v3483_v6 = vld [vmem:[%s4464_s3 + $0xf8] sm:$0xff]  }
0x1125   :  { %v3350_v16 = vpop.f32.mrf.mxu1  ;;  %3358 = vmatpush3.bf16.msra.mxu1 %v3483_v6 }
0x1126   :  { %v1818_v17 = vsel %vm380_vm2, %v1812_v14, -inf  ;;  %3359 = vmatprep.subr.bf16.mxu1 %v3608_v15 }
0x1127   :  { %1819 = vmax.xlane.f32.xlu1 %v1818_v17 }
0x1129   :  { %3360 = vmatpush3.bf16.msra.mxu1 %v3484_v27 }
0x112a   :  { %3361 = vmatprep.subr.bf16.mxu1 %v3608_v15 }
0x112d   :  { %3362 = vmatpush3.bf16.msra.mxu1 %v3485_v28  ;;  %v2965_v28 = vld [vmem:[%s4414_s13 + $0x1] ss:$0 sm:$0xff] }
0x112e   :  { %3363 = vmatprep.subr.bf16.mxu1 %v3608_v15 }
0x1131   :  { %3364 = vmatpush3.bf16.msra.mxu1 %v3486_v29 }
0x1132   :  { %3365 = vmatprep.subr.bf16.mxu1 %v3608_v15 }
0x1135   :  { %3366 = vmatpush3.bf16.msra.mxu1 %v3487_v30 }
0x1136   :  { %3367 = vmatprep.subr.bf16.mxu1 %v3608_v15 }
0x1139   :  { %3368 = vmatpush3.bf16.msra.mxu1 %v3488_v33 }
0x113a   :  { %3369 = vmatprep.subr.bf16.mxu1 %v3608_v15 }
0x113d   :  { %3370 = vmatpush3.bf16.msra.mxu1 %v3489_v53 }
0x113e   :  { %3371 = vmatprep.subr.bf16.mxu1 %v3608_v15 }
0x1141   :  { %3372 = vmatpush3.bf16.msra.mxu1 %v3490_v54 }
0x1142   :  { %3397 = vmatprep.subr.bf16.mxu1 %v3608_v15 }
0x11ac   :  { %v1817_v18 = vpop.xlane.xlu0 %1816 }
0x11ad   :  { %v1821_v19 = vsub.f32 %v1809_v11, %v1817_v18 }
0x11af   :  { %v1823_v20 = vmul.f32 1.442695, %v1821_v19 }
0x11b0   :  { %v1820_v21 = vpop.xlane.xlu1 %1819 }
0x11b1   :  { %3564 = vpow2.f32 %v1823_v20  ;;  %v1822_v22 = vsub.f32 %v1812_v14, %v1820_v21  ;;  %v3491_v20 = vld [vmem:[%s4416_s15 + $0x18] sm:$0xff]   ;;  %v3492_v21 = vld [vmem:[%s4416_s15 + $0x10] sm:$0xff]  }
0x11b3   :  { %v1825_v23 = vmul.f32 1.442695, %v1822_v22 }
0x11b5   :  { %3566 = vpow2.f32 %v1825_v23 }
0x11be   :  { %v3565_v2 = vpop.eup %3564 }
0x11bf   :  { %v1827_v24 = vsel %vm380_vm2, %v3565_v2, 0.0 }
0x11c0   :  { %1828 = vadd.xlane.f32.xlu0 %v1827_v24 }
0x11c2   :  { %v3567_v25 = vpop.eup %3566 }
0x11c3   :  { %v1830_v26 = vsel %vm380_vm2, %v3567_v25, 0.0 }
0x11c4   :  { %1831 = vadd.xlane.f32.xlu1 %v1830_v26 }
0x1249   :  { %v1829_v35 = vpop.xlane.xlu0 %1828 }
0x124a   :  { %3568 = vrcp.f32 %v1829_v35  ;;  %v2966_v35 = vld [vmem:[%s4415_s14 + $0x1] ss:$0 sm:$0xff] }
0x124d   :  { %v1832_v36 = vpop.xlane.xlu1 %1831 }
0x124e   :  { %3570 = vrcp.f32 %v1832_v36 }
0x1257   :  { %v3569_v37 = vpop.eup %3568 }
0x1258   :  { %v1835_v39 = vmul.f32 %v3569_v37, %v3565_v2 }
0x125b   :  { %v3571_v38 = vpop.eup %3570 }
0x125c   :  { %v1836_v40 = vmul.f32 %v3571_v38, %v3567_v25 }
0x125e   :  { %v1837_v42 = vpack.c.bf16 %v1836_v40, %v1835_v39  ;;  %v3493_v40 = vld [vmem:[%s4418_s17 + $0x38] sm:$0xff]  }
0x1260   :  { %3354 = vmatmul.mubr.msk.bf16.vlgmr.msra.gmra.mxu0 %vm380_vm2, %v1837_v42  ;;  %v3495_v42 = vld [vmem:[%s4418_s17 + $0x28] sm:$0xff]  }
0x1261   :  { %3378 = vmatpush3.bf16.msra.mxu0 %v3475_v41  ;;  %3393 = vmatprep.mubr.msk.bf16.mxu0 %vm3609_vm1, %v3608_v15  ;;  %v3494_v41 = vld [vmem:[%s4418_s17 + $0x30] sm:$0xff]  }
0x1262   :  { %3379 = vmatprep.subr.bf16.mxu0 %v3608_v15 }
0x1265   :  { %3380 = vmatpush3.bf16.msra.mxu0 %v3476_v43  ;;  %v3496_v43 = vld [vmem:[%s4418_s17 + $0x20] sm:$0xff]  }
0x1266   :  { %3381 = vmatprep.subr.bf16.mxu0 %v3608_v15 }
0x1269   :  { %3382 = vmatpush3.bf16.msra.mxu0 %v3477_v46  ;;  %v2972_v46 = vld [vmem:[%s4417_s16 + $0x1] ss:$0 sm:$0xff] }
0x126a   :  { %3383 = vmatprep.subr.bf16.mxu0 %v3608_v15 }
0x126d   :  { %3384 = vmatpush3.bf16.msra.mxu0 %v3478_v48 }
0x126e   :  { %3385 = vmatprep.subr.bf16.mxu0 %v3608_v15 }
0x1271   :  { %3386 = vmatpush3.bf16.msra.mxu0 %v3479_v49 }
0x1272   :  { %3387 = vmatprep.subr.bf16.mxu0 %v3608_v15 }
0x1275   :  { %3388 = vmatpush3.bf16.msra.mxu0 %v3480_v50 }
0x1276   :  { %3389 = vmatprep.subr.bf16.mxu0 %v3608_v15 }
0x1279   :  { %3390 = vmatpush3.bf16.msra.mxu0 %v3481_v51 }
0x127a   :  { %3391 = vmatprep.subr.bf16.mxu0 %v3608_v15 }
0x127d   :  { %3392 = vmatpush3.bf16.msra.mxu0 %v3482_v52 }
0x127e   :  { %3405 = vmatprep.subr.bf16.mxu0 %v3608_v15 }
0x1280   :  { %3394 = vmatmul.mubr.bf16.vlgmr.msra.gmra.mxu0 %v1573_v0 }
0x1281   :  { %3413 = vmatprep.mubr.msk.bf16.mxu0 %vm3609_vm1, %v3608_v15  ;;  %3406 = vmatpush3.bf16.msra.mxu0 %v3493_v40 }
0x1282   :  { %3407 = vmatprep.subr.bf16.mxu0 %v3608_v15 }
0x1285   :  { %3408 = vmatpush3.bf16.msra.mxu0 %v3494_v41 }
0x1286   :  { %3409 = vmatprep.subr.bf16.mxu0 %v3608_v15 }
0x1289   :  { %3410 = vmatpush3.bf16.msra.mxu0 %v3495_v42 }
0x128a   :  { %3411 = vmatprep.subr.bf16.mxu0 %v3608_v15 }
0x128d   :  { %3412 = vmatpush3.bf16.msra.mxu0 %v3496_v43 }
0x1320   :  { %v1876_v55 = vpop.f32.mrf.mxu0 }
0x1322   :  { %v3355_v56 = vpop.f32.mrf.mxu0 }
0x1324   :  { %v1879_v57 = vpop.f32.mrf.mxu0 }
0x1325   :  { %v1900_v58 = vpack.c.bf16 %v1879_v57, %v1876_v55 }
0x1326   :  { %v3356_v59 = vpop.f32.mrf.mxu0 }
0x1327   :  { %3374 = vmatmul.mubr.bf16.vlgmr.msra.gmra.mxu1 %v1900_v58 }
0x1328   :  { %3401 = vmatprep.mubr.msk.bf16.mxu1 %vm3609_vm1, %v3608_v15  ;;  %3398 = vmatpush3.bf16.msra.mxu1 %v3491_v20 }
0x1329   :  { %3399 = vmatprep.subr.bf16.mxu1 %v3608_v15 }
0x132c   :  { %3400 = vmatpush3.bf16.msra.mxu1 %v3492_v21 }
0x132d   :  { %3417 = vmatprep.subr.bf16.mxu1 %v3608_v15 }
0x1340   :  { %v2072_v34 = vpop.f32.mrf.mxu0 }
0x1342   :  { %v3395_v60 = vpop.f32.mrf.mxu0 }
0x1344   :  { %v2075_v61 = vpop.f32.mrf.mxu0 }
0x1346   :  { %v3396_v62 = vpop.f32.mrf.mxu0 }
0x13e7   :  { %v1983_v63 = vpop.f32.mrf.mxu1 }
0x13e8   :  { %v2073_v0 = vadd.f32 %v2072_v34, %v1983_v63 }
0x13e9   :  { %v3375_v1 = vpop.f32.mrf.mxu1 }
0x13ea   :  { %v2079_v4 = vadd.f32 %v2073_v0, %v4067_v44 }
0x13eb   :  { %v1986_v5 = vpop.f32.mrf.mxu1 }
0x13ec   :  { %v2076_v7 = vadd.f32 %v2075_v61, %v1986_v5  ;;  %v2089_v47 = vadd.f32 %v2962_v3, %v2079_v4 }
0x13ed   :  { %v3376_v8 = vpop.f32.mrf.mxu1 }
0x13ee   :  { %v2080_v9 = vadd.f32 %v2076_v7, %v4069_v45  ;;  %v2095_v10 = vsel %vm97_vm0, %v2089_v47, 0.0 }
0x13ef   :  { %2096 = vadd.xlane.f32.xlu0 %v2095_v10 }
0x13f0   :  { %v2090_v31 = vadd.f32 %v2962_v3, %v2080_v9  ;;  %v2985_v9 = vld [vmem:[%s4419_s18 + $0x1] ss:$0 sm:$0xff] }
0x13f2   :  { %v2098_v11 = vsel %vm97_vm0, %v2090_v31, 0.0 }
0x13f3   :  { %2099 = vadd.xlane.f32.xlu1 %v2098_v11 }
0x1478   :  { %v2097_v12 = vpop.xlane.xlu0 %2096 }
0x1479   :  { %v2101_v32 = vmul.f32 0.03125, %v2097_v12 }
0x147b   :  { %v2103_v13 = vsub.f32 %v2089_v47, %v2101_v32 }
0x147c   :  { %v2100_v14 = vpop.xlane.xlu1 %2099 }
0x147d   :  { %v2102_v16 = vmul.f32 0.03125, %v2100_v14  ;;  %v2105_v17 = vmul.f32 %v2103_v13, %v2103_v13 }
0x147f   :  { %v2104_v44 = vsub.f32 %v2090_v31, %v2102_v16  ;;  %v2107_v18 = vsel %vm97_vm0, %v2105_v17, 0.0 }
0x1480   :  { %2108 = vadd.xlane.f32.xlu0 %v2107_v18 }
0x1481   :  { %v2106_v19 = vmul.f32 %v2104_v44, %v2104_v44 }
0x1483   :  { %v2110_v45 = vsel %vm97_vm0, %v2106_v19, 0.0 }
0x1484   :  { %2111 = vadd.xlane.f32.xlu1 %v2110_v45 }
0x1509   :  { %v2109_v22 = vpop.xlane.xlu0 %2108 }
0x150a   :  { %v2113_v23 = vmul.f32 0.03125, %v2109_v22 }
0x150c   :  { %v2115_v2 = vadd.f32 1e-12, %v2113_v23 }
0x150d   :  { %v2112_v24 = vpop.xlane.xlu1 %2111 }
0x150e   :  { %3572 = vrsqrt.f32 %v2115_v2  ;;  %v2114_v25 = vmul.f32 0.03125, %v2112_v24 }
0x1510   :  { %v2116_v26 = vadd.f32 1e-12, %v2114_v25 }
0x1512   :  { %3574 = vrsqrt.f32 %v2116_v26  ;;  %v3497_v26 = vld [vmem:[%s4422_s21 + $0x8] sm:$0xff]  }
0x151b   :  { %v3573_v6 = vpop.eup %3572 }
0x151c   :  { %v2119_v27 = vmul.f32 %v3573_v6, %v2103_v13  ;;  %v3498_v6 = vld [vmem:[%s4422_s21] sm:$0xff]  }
0x151e   :  { %v2127_v33 = vmul.f32 %v2965_v28, %v2119_v27 }
0x151f   :  { %v3575_v29 = vpop.eup %3574 }
0x1520   :  { %v2120_v30 = vmul.f32 %v3575_v29, %v2104_v44  ;;  %v2135_v37 = vadd.f32 %v2966_v35, %v2127_v33 }
0x1522   :  { %v2128_v36 = vmul.f32 %v2965_v28, %v2120_v30 }
0x1524   :  { %v2136_v38 = vadd.f32 %v2966_v35, %v2128_v36 }
0x1526   :  { %v2142_v39 = vpack.c.bf16 %v2136_v38, %v2135_v37 }
0x1528   :  { %3402 = vmatmul.mubr.msk.bf16.vlgmr.msra.gmra.mxu1 %vm97_vm0, %v2142_v39  ;;  %v2993_v39 = vld [vmem:[%s4420_s19 + $0x1] ss:$0 sm:$0xff] }
0x1529   :  { %3421 = vmatprep.mubr.msk.bf16.mxu1 %vm3609_vm1, %v3608_v15  ;;  %3418 = vmatpush3.bf16.msra.mxu1 %v3497_v26 }
0x152a   :  { %3419 = vmatprep.subr.bf16.mxu1 %v3608_v15  ;;  %v2994_v15 = vld [vmem:[%s4421_s20 + $0x1] ss:$0 sm:$0xff] }
0x152d   :  { %3420 = vmatpush3.bf16.msra.mxu1 %v3498_v6 }
0x15e8   :  { %v2200_v48 = vpop.f32.mrf.mxu1 }
0x15e9   :  { %v2201_v49 = vadd.f32 %v2972_v46, %v2200_v48 }
0x15ea   :  { %v3403_v50 = vpop.f32.mrf.mxu1 }
0x15eb   :  { %v2209_v51 = vmul.f32 0.044715, %v2201_v49  ;;  %v2207_v3 = vmul.f32 0.5, %v2201_v49 }
0x15ec   :  { %v2203_v52 = vpop.f32.mrf.mxu1 }
0x15ed   :  { %v2211_v53 = vmul.f32 %v2209_v51, %v2201_v49  ;;  %v2204_v54 = vadd.f32 %v2972_v46, %v2203_v52  ;;  %v3501_v51 = vld [vmem:[%s4425_s24 + $0x4] ss:$8 sps:$4 sm:$0xff]   ;;  %v3499_v52 = vld [vmem:[%s4425_s24] ss:$8 sps:$4 sm:$0xff]  }
0x15ee   :  { %v3404_v55 = vpop.f32.mrf.mxu1  ;;  %2468 = vmatprep.subr.bf16.mxu1 %v3501_v51 }
0x15ef   :  { %v2213_v56 = vmul.f32 %v2211_v53, %v2201_v49  ;;  %v2210_v57 = vmul.f32 0.044715, %v2204_v54  ;;  %v2208_v4 = vmul.f32 0.5, %v2204_v54  ;;  %v3504_v53 = vld [vmem:[%s4424_s23 + $0x14] ss:$8 sps:$4 sm:$0xff]  }
0x15f0   :  { %v2437_v55 = vld [vmem:[%s4466_s4] sm:$0x3]  ;;  %2530 = vmatprep.subr.bf16.mxu0 %v3504_v53 }
0x15f1   :  { %v2215_v58 = vadd.f32 %v2213_v56, %v2201_v49  ;;  %v2212_v59 = vmul.f32 %v2210_v57, %v2204_v54  ;;  %v2440_v56 = vpack.c.bf16 %v2437_v55, %v2437_v55  ;;  %v3610_v57 = vmov 0  }
0x15f3   :  { %v2217_v34 = vmul.f32 0.7978846, %v2215_v58  ;;  %v2214_v60 = vmul.f32 %v2212_v59, %v2204_v54  ;;  %v3507_v58 = vld [vmem:[%s4424_s23 + $0x4] ss:$8 sps:$4 sm:$0xff]   ;;  %v3505_v59 = vld [vmem:[%s4424_s23] ss:$8 sps:$4 sm:$0xff]  }
0x15f5   :  { %3576 = vtanh.f32 %v2217_v34  ;;  %v2216_v61 = vadd.f32 %v2214_v60, %v2204_v54  ;;  %v3502_v54 = vld [vmem:[%s4424_s23 + $0x10] ss:$8 sps:$4 sm:$0xff]   ;;  %s3611_s23 = smov [#allocation2]  }
0x15f6   :  { %v3508_v34 = vld [vmem:[%s4427_s26 + $0x78] sm:$0xff]   ;;  %s2759_s12 = sshll.u32 %s3611_s23, 4  ;;  %s2760_s12 = int_to_ptr.vmem [resolvable:$true] %s2759_s12 }
0x15f7   :  { %v2218_v62 = vmul.f32 0.7978846, %v2216_v61  ;;  %v3509_v60 = vld [vmem:[%s4427_s26 + $0x38] sm:$0xff]   ;;  %v3510_v61 = vld [vmem:[%s4427_s26 + $0x70] sm:$0xff]   ;;  %s3586_s21 = scalar_lea.vmem %s2760_s12, 32  ;;  %p3591_p1 = scmp.lt.s32.totalorder %s2760_s12, %s2760_s12 }
0x15f8   :  { %p3587_p0 = scmp.ne.s32.totalorder %s2760_s12, %s3586_s21  ;;  %p3592_p2 = scmp.lt.s32.totalorder %s3586_s21, %s3586_s21 }
0x15f9   :  { %3578 = vtanh.f32 %v2218_v62  ;;  %v3511_v62 = vld [vmem:[%s4427_s26 + $0x30] sm:$0xff]  }
0x15fa   :  { %p3593_p3 = por %p3592_p2, %p3591_p1 }
0x15fc   :  { %p3594_p4 = pnand %p3593_p3, %p3587_p0 }
0x1602   :  { %v3577_v63 = vpop.eup %3576 }
0x1603   :  { %v2221_v0 = vadd.f32 1.0, %v3577_v63  ;;  %v3512_v63 = vld [vmem:[%s4427_s26 + $0x68] sm:$0xff]  }
0x1605   :  { %v2223_v7 = vmul.f32 %v2221_v0, %v2207_v3  ;;  %v3513_v0 = vld [vmem:[%s4427_s26 + $0x28] sm:$0xff]   ;;  %v3515_v3 = vld [vmem:[%s4427_s26 + $0x20] sm:$0xff]  }
0x1606   :  { %v3579_v1 = vpop.eup %3578 }
0x1607   :  { %v2222_v5 = vadd.f32 1.0, %v3579_v1  ;;  %v3514_v1 = vld [vmem:[%s4427_s26 + $0x60] sm:$0xff]  }
0x1609   :  { %v2224_v47 = vmul.f32 %v2222_v5, %v2208_v4  ;;  %v3516_v4 = vld [vmem:[%s4427_s26 + $0x58] sm:$0xff]  }
0x160a   :  { %v3517_v5 = vld [vmem:[%s4427_s26 + $0x18] sm:$0xff]  }
0x160b   :  { %v2234_v8 = vpack.c.bf16 %v2224_v47, %v2223_v7  ;;  %v2995_v7 = vld [vmem:[%s4423_s22] ss:$0 sm:$0xff] }
0x160d   :  { %3414 = vmatmul.mubr.msk.bf16.vlgmr.msra.gmra.mxu0 %vm1152_vm3, %v2234_v8 }
0x160e   :  { %2531 = vmatpush1.bf16.msra.mxu0 %v3502_v54  ;;  %2550 = vmatprep.mubr.bf16.mxu0 %v3610_v57 }
0x160f   :  { %2532 = vmatprep.subr.bf16.mxu0 %v3507_v58 }
0x1612   :  { %2533 = vmatpush1.bf16.msra.mxu0 %v3505_v59 }
0x16cd   :  { %v2304_v10 = vpop.f32.mrf.mxu0 }
0x16ce   :  { %v2305_v31 = vadd.f32 %v2985_v9, %v2304_v10 }
0x16cf   :  { %v3415_v11 = vpop.f32.mrf.mxu0 }
0x16d0   :  { %v2311_v12 = vadd.f32 %v2305_v31, %v2135_v37 }
0x16d1   :  { %v2307_v32 = vpop.f32.mrf.mxu0 }
0x16d2   :  { %v2308_v13 = vadd.f32 %v2985_v9, %v2307_v32  ;;  %v2317_v14 = vsel %vm97_vm0, %v2311_v12, 0.0 }
0x16d3   :  { %2318 = vadd.xlane.f32.xlu1 %v2317_v14  ;;  %v3416_v16 = vpop.f32.mrf.mxu0 }
0x16d4   :  { %v2312_v17 = vadd.f32 %v2308_v13, %v2136_v38  ;;  %v3518_v16 = vld [vmem:[%s4427_s26 + $0x50] sm:$0xff]  }
0x16d6   :  { %v2320_v44 = vsel %vm97_vm0, %v2312_v17, 0.0 }
0x16d7   :  { %2321 = vadd.xlane.f32.xlu0 %v2320_v44 }
0x175c   :  { %v2319_v18 = vpop.xlane.xlu1 %2318 }
0x175d   :  { %v2323_v19 = vmul.f32 0.03125, %v2319_v18  ;;  %v3520_v18 = vld [vmem:[%s4427_s26 + $0x48] sm:$0xff]  }
0x175f   :  { %v2325_v45 = vsub.f32 %v2311_v12, %v2323_v19  ;;  %v3521_v19 = vld [vmem:[%s4427_s26 + $0x8] sm:$0xff]  }
0x1760   :  { %v2322_v20 = vpop.xlane.xlu0 %2321 }
0x1761   :  { %v2324_v21 = vmul.f32 0.03125, %v2322_v20  ;;  %v2327_v22 = vmul.f32 %v2325_v45, %v2325_v45  ;;  %v3523_v20 = vld [vmem:[%s4427_s26] sm:$0xff]  }
0x1763   :  { %v2326_v23 = vsub.f32 %v2312_v17, %v2324_v21  ;;  %v2329_v2 = vsel %vm97_vm0, %v2327_v22, 0.0  ;;  %v3519_v17 = vld [vmem:[%s4427_s26 + $0x10] sm:$0xff]   ;;  %v2561_v21 = vlaneseq }
0x1764   :  { %2330 = vadd.xlane.f32.xlu1 %v2329_v2  ;;  %v2559_v2 = vld [vmem:[%s4426_s25] sm:$0x3] }
0x1765   :  { %v2328_v24 = vmul.f32 %v2326_v23, %v2326_v23  ;;  %v2562_v22 = vshrl.u32 %v2561_v21, 7 }
0x1767   :  { %v2332_v25 = vsel %vm97_vm0, %v2328_v24, 0.0  ;;  %v2567_v24 = vsub.s32 1, %v2562_v22 }
0x1768   :  { %2333 = vadd.xlane.f32.xlu0 %v2332_v25 }
0x17ed   :  { %v2331_v27 = vpop.xlane.xlu1 %2330 }
0x17ee   :  { %v2335_v28 = vmul.f32 0.03125, %v2331_v27  ;;  %v2568_v27 = vrot.slane %v2559_v2, %v2567_v24 }
0x17f0   :  { %v2337_v29 = vadd.f32 1e-12, %v2335_v28 }
0x17f1   :  { %v2334_v30 = vpop.xlane.xlu0 %2333 }
0x17f2   :  { %3580 = vrsqrt.f32 %v2337_v29  ;;  %v2336_v33 = vmul.f32 0.03125, %v2334_v30 }
0x17f4   :  { %v2338_v35 = vadd.f32 1e-12, %v2336_v33 }
0x17f6   :  { %3582 = vrsqrt.f32 %v2338_v35 }
0x17ff   :  { %v3581_v36 = vpop.eup %3580 }
0x1800   :  { %v2341_v37 = vmul.f32 %v3581_v36, %v2325_v45  ;;  %v3522_v45 = vld [vmem:[%s4427_s26 + $0x40] sm:$0xff]  }
0x1802   :  { %v2349_v41 = vmul.f32 %v2993_v39, %v2341_v37 }
0x1803   :  { %v3583_v38 = vpop.eup %3582 }
0x1804   :  { %v2342_v40 = vmul.f32 %v3583_v38, %v2326_v23  ;;  %v2357_v46 = vadd.f32 %v2994_v15, %v2349_v41  ;;  %v2563_v23 = vsub.s32 0, %v2562_v22 }
0x1806   :  { %v2350_v42 = vmul.f32 %v2993_v39, %v2342_v40  ;;  %v2564_v25 = vrot.slane %v2559_v2, %v2563_v23 }
0x1808   :  { %v2358_v43 = vadd.f32 %v2994_v15, %v2350_v42  ;;  %v3007_v15 = vld [vmem:[%s4428_s27] ss:$0 sm:$0xff] }
0x180a   :  { %v2360_v48 = vrot.slane %v2358_v43, 7 }
0x180c   :  { %v2363_v49 = vsel %vm2362_vm4, %v2357_v46, %v2360_v48 }
0x180d   :  { %v2368_v50 = vpack.c.bf16 %v2363_v49, %v2363_v49 }
0x180f   :  { %3422 = vmatmul.mubr.msk.bf16.vlgmr.msra.gmra.mxu1 %vm97_vm0, %v2368_v50 }
0x1810   :  { %2469 = vmatpush1.bf16.msra.mxu1 %v3499_v52  ;;  %2486 = vmatprep.mubr.bf16.mxu1 %v3610_v57 }
0x1811   :  { %3131 = vmatprep.subr.bf16.mxu1 %v3508_v34 }
0x1817   :  { %3001 = vmatmul.mubr.msk.bf16.vlgmr.msra.gmra.mxu1 %vm380_vm2, %v2440_v56 }
0x1818   :  { %3132 = vmatpush3.bf16.msra.mxu1 %v3509_v60 }
0x1819   :  { %3133 = vmatprep.subr.bf16.mxu1 %v3510_v61 }
0x181c   :  { %3134 = vmatpush3.bf16.msra.mxu1 %v3511_v62 }
0x181d   :  { %3135 = vmatprep.subr.bf16.mxu1 %v3512_v63 }
0x1820   :  { %3136 = vmatpush3.bf16.msra.mxu1 %v3513_v0 }
0x1821   :  { %3137 = vmatprep.subr.bf16.mxu1 %v3514_v1 }
0x1824   :  { %3138 = vmatpush3.bf16.msra.mxu1 %v3515_v3 }
0x1825   :  { %3139 = vmatprep.subr.bf16.mxu1 %v3516_v4 }
0x1828   :  { %3140 = vmatpush3.bf16.msra.mxu1 %v3517_v5 }
0x1829   :  { %3141 = vmatprep.subr.bf16.mxu1 %v3518_v16 }
0x182c   :  { %3142 = vmatpush3.bf16.msra.mxu1 %v3519_v17 }
0x182d   :  { %3143 = vmatprep.subr.bf16.mxu1 %v3520_v18 }
0x1830   :  { %3144 = vmatpush3.bf16.msra.mxu1 %v3521_v19 }
0x1831   :  { %3145 = vmatprep.subr.bf16.mxu1 %v3522_v45 }
0x1834   :  { %3146 = vmatpush3.bf16.msra.mxu1 %v3523_v20 }
0x18cf   :  { %v2425_v47 = vpop.f32.mrf.mxu1 }
0x18d0   :  { %v2426_v8 = vadd.f32 %v2995_v7, %v2425_v47 }
0x18d1   :  { %v3423_v9 = vpop.f32.mrf.mxu1 }
0x18d2   :  { %3584 = vtanh.f32 %v2426_v8 }
0x18d3   :  { %v2428_v10 = vpop.f32.mrf.mxu1 }
0x18d5   :  { %v3424_v31 = vpop.f32.mrf.mxu1 }
0x18d7   :  { %v2488_v32 = vpop.f32.mrf.mxu1 }
0x18d9   :  { %v2490_v13 = vpop.f32.mrf.mxu1 }
0x18db   :  { %v2492_v14 = vpop.f32.mrf.mxu1 }
0x18dd   :  { %v2493_v44 = vpop.f32.mrf.mxu1 }
0x18df   :  { %v3585_v11 = vpop.eup %3584 }
0x18e0   :  { %v2436_v12 = vpack.c.bf16 %v3585_v11, %v3585_v11 }
0x18e2   :  { %3006 = vmatmul.mubr.msk.bf16.vlgmr.msra.gmra.mxu0 %vm97_vm0, %v2436_v12 }
0x19a2   :  { %v2552_v26 = vpop.f32.mrf.mxu0 }
0x19a3   :  { %v2553_v6 = vadd.f32 %v2552_v26, %v2488_v32 }
0x19a4   :  { %v2554_v28 = vpop.f32.mrf.mxu0 }
0x19a5   :  { %v2571_v29 = vadd.f32 %v2564_v25, %v2553_v6  ;;  %v2555_v30 = vadd.f32 %v2554_v28, %v2490_v13 }
0x19a6   :  { %v2556_v33 = vpop.f32.mrf.mxu0 }
0x19a7   :  { %v2572_v35 = vadd.f32 %v2568_v27, %v2555_v30  ;;  %v2573_v36 = vmax.f32 %v2571_v29, 0.0 }
0x19a8   :  { %v2557_v37 = vpop.f32.mrf.mxu0 }
0x19a9   :  { %v2574_v38 = vmax.f32 %v2572_v35, 0.0  ;;  %v2607_v40 = vpack.c.bf16 %v2573_v36, %v2573_v36 }
0x19ab   :  { %v2608_v39 = vpack.c.bf16 %v2574_v38, %v2574_v38 }
0x19ad   :  { %2744 = vmatprep.mubr.bf16.mxu1 %v2608_v39 }
0x19ae   :  { %2745 = vmatmul.mubr.bf16.vlgmr.msra.gmra.mxu1 %v2607_v40 }
0x1a6e   :  { %v3147_v41 = vpop.f32.mrf.mxu1 }
0x1a70   :  { %v3148_v42 = vpop.f32.mrf.mxu1 }
0x1a71   :  { %v3149_v43 = vadd.f32 %v3148_v42, %v3147_v41 }
0x1a72   :  { %v3150_v46 = vpop.f32.mrf.mxu1 }
0x1a73   :  { %v2747_v48 = vadd.f32 %v3149_v43, %v3007_v15 }
0x1a74   :  { %v3151_v49 = vpop.f32.mrf.mxu1 }
0x1a75   :  { %2752 = vst [vmem:[#allocation2] sm:$0x3] %v2747_v48 }
0x1a76   :  { %3597 = shalt.err (!%p3594_p4)
}
0x1a77   :  { %s4467_s15 = sld [smem:[#allocation18_spill]] }
0x1a7d   :  { %2762 = dma.vmem_to_hbm [thread:$0]  %s2760_s12, 32, %s4467_s15, [#allocation3]  }
0x1a7e   :  { %3606 = dma.done.wait [#allocation3], 32  }
0x1a7f   :  { %3607 = vsyncadd [#allocation3], 4294967264 }
0x1a80   :  { %2766 = vsyncpa [#allocation3], 1 }

</bundles_post_ra>
